<compile_context>
chip_gen: v5e
topology: v5e:2x2
jax: 0.10.0
libtpu: 0.0.40
codegen_flags: <defaults>
</compile_context>

<pallas_src>
import functools

import jax
import jax.numpy as jnp
from jax.experimental import pallas as pl
from jax.experimental.pallas import tpu as pltpu

_GRAY_W = (0.2989, 0.587, 0.114)


def _aug_kernel(bright_ref, contrast_ref, sat_ref, grayf_ref,
                x_ref, ah_ref, awt_ref, bh_ref, bwt_ref, gmat_ref,
                o_ref, awt_bd, bwt_bd, y_scr):
    """One (image-block, view) pair per grid step.

    bright/contrast/sat/grayf : VMEM (B,1,1) f32  per-image jitter scalars
    x_ref   : VMEM (B, H, 3W)  bf16  inputs in [-1,1], channels packed along lanes
    ah_ref  : VMEM (B, S, H)   bf16  0.5 * row crop+resize matrix (de-norm folded in)
    awt_ref : VMEM (B, W, S)   bf16  dense column crop+resize(+flip) matrix^T
    bh_ref  : VMEM (B, S, S)   bf16  gaussian-blur row matrix (reflection pad folded in)
    bwt_ref : VMEM (B, S, S)   bf16  dense gaussian-blur column matrix^T
    gmat_ref: VMEM (3S, 3S)    bf16  gray-broadcast matrix (luma replicated per channel)
    o_ref   : VMEM (B, S, 128k) bf16 augmented output in [0,1], lane-padded to 128
    awt_bd  : VMEM (3W, 3S)    bf16  scratch: block-diag column resize (built per image)
    bwt_bd  : VMEM (3S, 128k)  bf16  scratch: block-diag + lane-pad column blur
    y_scr   : VMEM (B, S, 3S)  bf16  scratch: per-block intermediate images
    """
    block_b = x_ref.shape[0]
    _, w, s = awt_ref.shape
    f32 = jnp.float32
    bf16 = jnp.bfloat16

    # Off-diagonal blocks of the in-kernel block-diagonal matrices must be zero.
    # Zero once per grid step (cheap VMEM stores); diagonal blocks are rewritten per image.
    awt_bd[...] = jnp.zeros_like(awt_bd)
    bwt_bd[...] = jnp.zeros_like(bwt_bd)

    # ---------- Phase A: per-image RandomResizedCrop (+hflip), de-norm*0.5 folded in ----
    def resize_body(i, carry):
        a = awt_ref[i]                                    # (W, S) dense column matrix
        awt_bd[0:w, 0:s] = a                              # expand to block-diag in VMEM
        awt_bd[w:2 * w, s:2 * s] = a
        awt_bd[2 * w:3 * w, 2 * s:3 * s] = a
        t = jnp.dot(ah_ref[i], x_ref[i], preferred_element_type=f32)            # (S, 3W)
        m = jnp.dot(t.astype(bf16), awt_bd[...], preferred_element_type=f32)    # 0.5*resize(x)
        y_scr[i] = m.astype(bf16)
        return carry

    jax.lax.fori_loop(0, block_b, resize_body, 0, unroll=2)

    # ---------- Phase B: ColorJitter + RandomGrayscale, stage-major over the block ------
    bright = bright_ref[...]          # (B,1,1)
    contrast = contrast_ref[...]
    sat = sat_ref[...]
    grayf = grayf_ref[...]

    y = y_scr[...].astype(f32)                                            # (B, S, 3S)
    # brightness + de-normalization fold: clip(b*(m + 0.5)) = clip(b*m + 0.5*b)
    y = jnp.clip(y * bright + 0.5 * bright, 0.0, 1.0)

    # contrast: blend with the grayscale-image mean (weighted lane reduction, no matmul)
    w_r, w_g, w_b = _GRAY_W
    lane = jax.lax.broadcasted_iota(jnp.int32, (1, 1, 3 * s), 2)
    wlane = jnp.where(lane < s, w_r, jnp.where(lane < 2 * s, w_g, w_b)).astype(f32)
    mean_g = jnp.sum(jnp.sum(y * wlane, axis=2, keepdims=True), axis=1, keepdims=True)
    mean_g = mean_g * (1.0 / (s * s))                                     # (B,1,1)
    y = jnp.clip(contrast * y + (1.0 - contrast) * mean_g, 0.0, 1.0)

    # saturation: blend with per-pixel grayscale -- ONE batched MXU matmul for the block
    gmat = gmat_ref[...]
    gray = jnp.dot(y.reshape(block_b * s, 3 * s).astype(bf16), gmat,
                   preferred_element_type=f32).reshape(block_b, s, 3 * s)
    y = jnp.clip(sat * y + (1.0 - sat) * gray, 0.0, 1.0)

    # RandomGrayscale
    gray = jnp.dot(y.reshape(block_b * s, 3 * s).astype(bf16), gmat,
                   preferred_element_type=f32).reshape(block_b, s, 3 * s)
    y = grayf * gray + (1.0 - grayf) * y
    y_scr[...] = y.astype(bf16)

    # ---------- Phase C: per-image separable GaussianBlur, lane-dense bf16 output -------
    def blur_body(i, carry):
        bm = bwt_ref[i]                                   # (S, S) dense column blur matrix
        bwt_bd[0:s, 0:s] = bm
        bwt_bd[s:2 * s, s:2 * s] = bm
        bwt_bd[2 * s:3 * s, 2 * s:3 * s] = bm
        z = jnp.dot(bh_ref[i], y_scr[i], preferred_element_type=f32)             # (S, 3S)
        z = jnp.dot(z.astype(bf16), bwt_bd[...], preferred_element_type=f32)     # (S, 128k)
        o_ref[i] = jnp.clip(z, 0.0, 1.0).astype(jnp.bfloat16)
        return carry

    jax.lax.fori_loop(0, block_b, blur_body, 0, unroll=2)


def _resize_matrix(crop, offset, full, out_size):
    """(out_size, full) bilinear sampling matrix for crop window [offset, offset+crop)."""
    out_idx = jnp.arange(out_size, dtype=jnp.float32)
    src = (out_idx + 0.5) * (crop / out_size) - 0.5 + offset
    src = jnp.clip(src, 0.0, full - 1.0)
    i0 = jnp.floor(src)
    frac = src - i0
    i0i = jnp.clip(i0, 0, full - 1).astype(jnp.int32)
    i1i = jnp.clip(i0i + 1, 0, full - 1)
    m = (1.0 - frac)[:, None] * jax.nn.one_hot(i0i, full, dtype=jnp.float32)
    m = m + frac[:, None] * jax.nn.one_hot(i1i, full, dtype=jnp.float32)
    return m


def _blur_matrix(taps, size, radius):
    """(size, size) matrix equal to a reflection-padded 1D gaussian convolution."""
    idx = jnp.arange(size)[:, None] + jnp.arange(-radius, radius + 1)[None, :]
    idx = jnp.abs(idx)
    idx = jnp.where(idx >= size, 2 * size - 2 - idx, idx)
    onehot = jax.nn.one_hot(idx, size, dtype=jnp.float32)          # (size, k, size)
    return jnp.einsum("k,iks->is", taps, onehot)


def _make_view_params(key, n, h, w, s, blur_radius):
    """Per-image random parameters and compact sampling matrices for one augmented view."""
    keys = jax.random.split(key, 11)

    # RandomResizedCrop (simplified always-valid sampling): scale (0.08,1.0), ratio (3/4,4/3)
    scale = jax.random.uniform(keys[0], (n,), minval=0.08, maxval=1.0)
    log_ratio = jax.random.uniform(
        keys[1], (n,), minval=jnp.log(3.0 / 4.0), maxval=jnp.log(4.0 / 3.0))
    area = scale * h * w
    ratio = jnp.exp(log_ratio)
    crop_w = jnp.clip(jnp.sqrt(area * ratio), 1.0, float(w))
    crop_h = jnp.clip(jnp.sqrt(area / ratio), 1.0, float(h))
    top = jax.random.uniform(keys[2], (n,)) * (h - crop_h)
    left = jax.random.uniform(keys[3], (n,)) * (w - crop_w)
    flip = jax.random.bernoulli(keys[4], 0.5, (n,))

    # ColorJitter(0.8, 0.8, 0.8, 0.2) with p=0.8; RandomGrayscale p=0.2
    apply_cj = jax.random.bernoulli(keys[5], 0.8, (n,))
    bright = jnp.where(apply_cj, jax.random.uniform(keys[6], (n,), minval=0.2, maxval=1.8), 1.0)
    contrast = jnp.where(apply_cj, jax.random.uniform(keys[7], (n,), minval=0.2, maxval=1.8), 1.0)
    sat = jnp.where(apply_cj, jax.random.uniform(keys[8], (n,), minval=0.2, maxval=1.8), 1.0)
    gray_flag = jax.random.bernoulli(keys[9], 0.2, (n,)).astype(jnp.float32)

    # GaussianBlur sigma ~ U(0.1, 2.0)
    sigma = jax.random.uniform(keys[10], (n,), minval=0.1, maxval=2.0)

    a_h = jax.vmap(lambda c, o: _resize_matrix(c, o, h, s))(crop_h, top)         # (N,S,H)
    a_w = jax.vmap(lambda c, o: _resize_matrix(c, o, w, s))(crop_w, left)        # (N,S,W)
    a_w = jnp.where(flip[:, None, None], a_w[:, ::-1, :], a_w)                   # fold hflip
    a_wt = jnp.transpose(a_w, (0, 2, 1))                                         # (N,W,S)

    d = jnp.arange(-blur_radius, blur_radius + 1, dtype=jnp.float32)
    taps = jnp.exp(-(d ** 2)[None, :] / (2.0 * sigma[:, None] ** 2))
    taps = taps / taps.sum(axis=1, keepdims=True)                                # (N,k)
    b = jax.vmap(lambda t: _blur_matrix(t, s, blur_radius))(taps)                # (N,S,S)
    b_wt = jnp.transpose(b, (0, 2, 1))

    return (bright.astype(jnp.float32), contrast.astype(jnp.float32),
            sat.astype(jnp.float32), gray_flag,
            (0.5 * a_h).astype(jnp.bfloat16),           # de-norm *0.5 folded into row resize
            a_wt.astype(jnp.bfloat16),
            b.astype(jnp.bfloat16),
            b_wt.astype(jnp.bfloat16))


def _augment_pair(x, key, *, size, blur_radius, max_block):
    n, c, h, w = x.shape
    assert c == 3, "GaussianBlur in the reference module is hard-wired to 3 channels"
    s = size

    block_b = max(1, min(max_block, n))
    nb = pl.cdiv(n, block_b)
    n_pad = nb * block_b

    k1, k2 = jax.random.split(key)
    v1 = _make_view_params(k1, n_pad, h, w, s, blur_radius)   # params for n_pad (no NaN pad)
    v2 = _make_view_params(k2, n_pad, h, w, s, blur_radius)

    def stack(i):
        return jnp.concatenate([v1[i], v2[i]], axis=0)        # (2*Npad, ...)

    bright = stack(0).reshape(2 * n_pad, 1, 1)
    contrast = stack(1).reshape(2 * n_pad, 1, 1)
    sat = stack(2).reshape(2 * n_pad, 1, 1)
    grayf = stack(3).reshape(2 * n_pad, 1, 1)
    ah = stack(4)                                              # (2Npad, S, H)  bf16
    awt = stack(5)                                             # (2Npad, W, S)  bf16
    bh = stack(6)                                              # (2Npad, S, S)  bf16
    bwt = stack(7)                                             # (2Npad, S, S)  bf16

    # Channel-packed bf16 input (lanes = 3W); shared by both views (x DMA elided for view 2).
    x_packed = jnp.transpose(x, (0, 2, 1, 3)).reshape(n, h, c * w)
    if n_pad > n:
        x_packed = jnp.pad(x_packed, ((0, n_pad - n), (0, 0), (0, 0)))
    x_packed = x_packed.astype(jnp.bfloat16)

    gw = jnp.array(_GRAY_W, dtype=jnp.float32)
    gmat = jnp.kron(jnp.broadcast_to(gw[:, None], (3, 3)),
                    jnp.eye(s, dtype=jnp.float32)).astype(jnp.bfloat16)          # (3S, 3S)

    out_lanes = 128 * pl.cdiv(3 * s, 128)   # lane-dense output (unmasked full-width stores)

    per_view = lambda b, v: (v * nb + b, 0, 0)

    out = pl.pallas_call(
        _aug_kernel,
        out_shape=jax.ShapeDtypeStruct((2 * n_pad, s, out_lanes), jnp.bfloat16),
        grid=(nb, 2),   # view innermost: consecutive steps reuse the same x block
        in_specs=[
            pl.BlockSpec((block_b, 1, 1), per_view),                 # brightness
            pl.BlockSpec((block_b, 1, 1), per_view),                 # contrast
            pl.BlockSpec((block_b, 1, 1), per_view),                 # saturation
            pl.BlockSpec((block_b, 1, 1), per_view),                 # grayscale flag
            pl.BlockSpec((block_b, h, c * w), lambda b, v: (b, 0, 0)),  # x (shared by views)
            pl.BlockSpec((block_b, s, h), per_view),                 # 0.5 * row resize
            pl.BlockSpec((block_b, w, s), per_view),                 # column resize (dense)
            pl.BlockSpec((block_b, s, s), per_view),                 # row blur
            pl.BlockSpec((block_b, s, s), per_view),                 # column blur (dense)
            pl.BlockSpec((3 * s, 3 * s), lambda b, v: (0, 0)),       # gray matrix (shared)
        ],
        out_specs=pl.BlockSpec((block_b, s, out_lanes), per_view),
        scratch_shapes=[
            pltpu.VMEM((3 * w, 3 * s), jnp.bfloat16),        # block-diag column-resize scratch
            pltpu.VMEM((3 * s, out_lanes), jnp.bfloat16),    # block-diag (+pad) column-blur
            pltpu.VMEM((block_b, s, 3 * s), jnp.bfloat16),   # per-block intermediate images
        ],
        compiler_params=pltpu.CompilerParams(
            dimension_semantics=("parallel", "parallel"),
            vmem_limit_bytes=32 * 1024 * 1024),
    )(bright, contrast, sat, grayf, x_packed, ah, awt, bh, bwt, gmat)

    # Strip lane padding, unpack channels, strip image padding, upcast to f32 (ToTensor dtype).
    out = out[:, :, :3 * s].reshape(2, n_pad, s, 3, s)
    out = jnp.transpose(out, (0, 1, 3, 2, 4))[:, :n].astype(jnp.float32)
    return out[0], out[1]


class Augment:
    """JAX/Pallas counterpart of the PyTorch Augment module (non-MNIST branch)."""

    def __init__(self, target_size, nc=3, dataset_name="cifar", max_block=64):
        assert nc == 3, "GaussianBlur in the reference module is hard-wired to 3 channels"
        self.size = target_size[0]
        kernel_size = int(0.1 * self.size)
        self.blur_radius = max(kernel_size // 2, 0)
        self.dataset_name = dataset_name
        self._fn = jax.jit(functools.partial(
            _augment_pair, size=self.size, blur_radius=self.blur_radius,
            max_block=max_block))

    def __call__(self, x, key):
        return self._fn(x, key)


if __name__ == "__main__":
    key = jax.random.PRNGKey(0)
    kx, kaug = jax.random.split(key)

    N, C, S = 2, 3, 32
    # GAN generator output is in [-1, 1] (forward does x*0.5 + 0.5)
    X = jnp.tanh(jax.random.normal(kx, (N, C, S, S), dtype=jnp.float32))

    aug = Augment(target_size=(S, S), nc=C, dataset_name="cifar")
    x_aug_1, x_aug_2 = aug(X, kaug)
    jax.block_until_ready((x_aug_1, x_aug_2))

    assert x_aug_1.shape == (N, C, S, S) and x_aug_2.shape == (N, C, S, S)
    assert x_aug_1.dtype == jnp.float32 and x_aug_2.dtype == jnp.float32
    assert bool(jnp.all(jnp.isfinite(x_aug_1))) and bool(jnp.all(jnp.isfinite(x_aug_2)))
    assert bool(jnp.all((x_aug_1 >= 0.0) & (x_aug_1 <= 1.0)))
    assert bool(jnp.all((x_aug_2 >= 0.0) & (x_aug_2 <= 1.0)))
    print("KERNEL_OK")
</pallas_src>

<mosaic_0001>
module attributes {stable_mosaic.version = 11 : i64} {
  func.func @_aug_kernel(%arg0: i32, %arg1: i32, %arg2: memref<2x1x1xf32, #tpu.memory_space<vmem>>, %arg3: memref<2x1x1xf32, #tpu.memory_space<vmem>>, %arg4: memref<2x1x1xf32, #tpu.memory_space<vmem>>, %arg5: memref<2x1x1xf32, #tpu.memory_space<vmem>>, %arg6: memref<2x32x96xbf16, #tpu.memory_space<vmem>>, %arg7: memref<2x32x32xbf16, #tpu.memory_space<vmem>>, %arg8: memref<2x32x32xbf16, #tpu.memory_space<vmem>>, %arg9: memref<2x32x32xbf16, #tpu.memory_space<vmem>>, %arg10: memref<2x32x32xbf16, #tpu.memory_space<vmem>>, %arg11: memref<96x96xbf16, #tpu.memory_space<vmem>>, %arg12: memref<2x32x128xbf16, #tpu.memory_space<vmem>>, %arg13: memref<96x96xbf16, #tpu.memory_space<vmem>>, %arg14: memref<96x128xbf16, #tpu.memory_space<vmem>>, %arg15: memref<2x32x96xbf16, #tpu.memory_space<vmem>>) attributes {dimension_semantics = [#tpu.dimension_semantics<parallel>, #tpu.dimension_semantics<parallel>], iteration_bounds = array<i64: 1, 2>, scalar_prefetch = 0 : i64, scratch_operands = 3 : i64, tpu.core_type = #tpu.core_type<tc>, window_params = [{transform_indices = @transform_0, window_bounds = array<i64: 2, 1, 1>}, {transform_indices = @transform_1, window_bounds = array<i64: 2, 1, 1>}, {transform_indices = @transform_2, window_bounds = array<i64: 2, 1, 1>}, {transform_indices = @transform_3, window_bounds = array<i64: 2, 1, 1>}, {transform_indices = @transform_4, window_bounds = array<i64: 2, 32, 96>}, {transform_indices = @transform_5, window_bounds = array<i64: 2, 32, 32>}, {transform_indices = @transform_6, window_bounds = array<i64: 2, 32, 32>}, {transform_indices = @transform_7, window_bounds = array<i64: 2, 32, 32>}, {transform_indices = @transform_8, window_bounds = array<i64: 2, 32, 32>}, {pipeline_mode = #tpu.pipeline_mode<synchronous>, transform_indices = @transform_9, window_bounds = array<i64: 96, 96>}, {transform_indices = @transform_10, window_bounds = array<i64: 2, 32, 128>}]} {
    %cst = arith.constant 0.000000e+00 : bf16
    %0 = vector.broadcast %cst : bf16 to vector<96x96xbf16>
    %c0 = arith.constant 0 : index
    %c0_0 = arith.constant 0 : index
    %1 = vector.load %arg13[%c0, %c0_0] : memref<96x96xbf16, #tpu.memory_space<vmem>>, vector<96x96xbf16>
    tpu.vector_store %arg13[%c0, %c0_0], %0 {strides = array<i32>} : memref<96x96xbf16, #tpu.memory_space<vmem>>, vector<96x96xbf16>,
    %cst_1 = arith.constant 0.000000e+00 : bf16
    %2 = vector.broadcast %cst_1 : bf16 to vector<96x128xbf16>
    %c0_2 = arith.constant 0 : index
    %c0_3 = arith.constant 0 : index
    %3 = vector.load %arg14[%c0_2, %c0_3] : memref<96x128xbf16, #tpu.memory_space<vmem>>, vector<96x128xbf16>
    tpu.vector_store %arg14[%c0_2, %c0_3], %2 {strides = array<i32>} : memref<96x128xbf16, #tpu.memory_space<vmem>>, vector<96x128xbf16>,
    %c0_i32 = arith.constant 0 : i32
    %4 = arith.index_cast %c0_i32 : i32 to index
    %c0_4 = arith.constant 0 : index
    %c0_5 = arith.constant 0 : index
    %5 = vector.load %arg8[%4, %c0_4, %c0_5] : memref<2x32x32xbf16, #tpu.memory_space<vmem>>, vector<1x32x32xbf16>
    %6 = vector.shape_cast %5 : vector<1x32x32xbf16> to vector<32x32xbf16>
    %c0_6 = arith.constant 0 : index
    %c0_7 = arith.constant 0 : index
    %7 = vector.load %arg13[%c0_6, %c0_7] : memref<96x96xbf16, #tpu.memory_space<vmem>>, vector<32x32xbf16>
    tpu.vector_store %arg13[%c0_6, %c0_7], %6 {strides = array<i32>} : memref<96x96xbf16, #tpu.memory_space<vmem>>, vector<32x32xbf16>,
    %c32 = arith.constant 32 : index
    %c32_8 = arith.constant 32 : index
    %8 = vector.load %arg13[%c32, %c32_8] : memref<96x96xbf16, #tpu.memory_space<vmem>>, vector<32x32xbf16>
    tpu.vector_store %arg13[%c32, %c32_8], %6 {strides = array<i32>} : memref<96x96xbf16, #tpu.memory_space<vmem>>, vector<32x32xbf16>,
    %c64 = arith.constant 64 : index
    %c64_9 = arith.constant 64 : index
    %9 = vector.load %arg13[%c64, %c64_9] : memref<96x96xbf16, #tpu.memory_space<vmem>>, vector<32x32xbf16>
    tpu.vector_store %arg13[%c64, %c64_9], %6 {strides = array<i32>} : memref<96x96xbf16, #tpu.memory_space<vmem>>, vector<32x32xbf16>,
    %10 = arith.index_cast %c0_i32 : i32 to index
    %c0_10 = arith.constant 0 : index
    %c0_11 = arith.constant 0 : index
    %11 = vector.load %arg7[%10, %c0_10, %c0_11] : memref<2x32x32xbf16, #tpu.memory_space<vmem>>, vector<1x32x32xbf16>
    %12 = vector.shape_cast %11 : vector<1x32x32xbf16> to vector<32x32xbf16>
    %13 = arith.index_cast %c0_i32 : i32 to index
    %c0_12 = arith.constant 0 : index
    %c0_13 = arith.constant 0 : index
    %14 = vector.load %arg6[%13, %c0_12, %c0_13] : memref<2x32x96xbf16, #tpu.memory_space<vmem>>, vector<1x32x96xbf16>
    %15 = vector.shape_cast %14 : vector<1x32x96xbf16> to vector<32x96xbf16>
    %cst_14 = arith.constant dense<0.000000e+00> : vector<32x96xf32>
    %16 = tpu.matmul %12, %15, %cst_14 {dimension_numbers = #tpu.dot_dimension_numbers<[1], [0], [0], [1], [0, 0, 1, 1], [], []>} : vector<32x32xbf16>, vector<32x96xbf16>, vector<32x96xf32> -> vector<32x96xf32>
    %17 = arith.truncf %16 : vector<32x96xf32> to vector<32x96xbf16>
    %c0_15 = arith.constant 0 : index
    %c0_16 = arith.constant 0 : index
    %18 = vector.load %arg13[%c0_15, %c0_16] : memref<96x96xbf16, #tpu.memory_space<vmem>>, vector<96x96xbf16>
    %cst_17 = arith.constant dense<0.000000e+00> : vector<32x96xf32>
    %19 = tpu.matmul %17, %18, %cst_17 {dimension_numbers = #tpu.dot_dimension_numbers<[1], [0], [0], [1], [0, 0, 1, 1], [], []>} : vector<32x96xbf16>, vector<96x96xbf16>, vector<32x96xf32> -> vector<32x96xf32>
    %20 = arith.truncf %19 : vector<32x96xf32> to vector<32x96xbf16>
    %21 = arith.index_cast %c0_i32 : i32 to index
    %c0_18 = arith.constant 0 : index
    %c0_19 = arith.constant 0 : index
    %22 = vector.load %arg15[%21, %c0_18, %c0_19] : memref<2x32x96xbf16, #tpu.memory_space<vmem>>, vector<1x32x96xbf16>
    %23 = vector.shape_cast %22 : vector<1x32x96xbf16> to vector<32x96xbf16>
    %24 = vector.shape_cast %20 : vector<32x96xbf16> to vector<1x32x96xbf16>
    tpu.vector_store %arg15[%21, %c0_18, %c0_19], %24 {strides = array<i32>} : memref<2x32x96xbf16, #tpu.memory_space<vmem>>, vector<1x32x96xbf16>,
    %c1_i32 = arith.constant 1 : i32
    %25 = arith.index_cast %c1_i32 : i32 to index
    %c0_20 = arith.constant 0 : index
    %c0_21 = arith.constant 0 : index
    %26 = vector.load %arg8[%25, %c0_20, %c0_21] : memref<2x32x32xbf16, #tpu.memory_space<vmem>>, vector<1x32x32xbf16>
    %27 = vector.shape_cast %26 : vector<1x32x32xbf16> to vector<32x32xbf16>
    %c0_22 = arith.constant 0 : index
    %c0_23 = arith.constant 0 : index
    %28 = vector.load %arg13[%c0_22, %c0_23] : memref<96x96xbf16, #tpu.memory_space<vmem>>, vector<32x32xbf16>
    tpu.vector_store %arg13[%c0_22, %c0_23], %27 {strides = array<i32>} : memref<96x96xbf16, #tpu.memory_space<vmem>>, vector<32x32xbf16>,
    %c32_24 = arith.constant 32 : index
    %c32_25 = arith.constant 32 : index
    %29 = vector.load %arg13[%c32_24, %c32_25] : memref<96x96xbf16, #tpu.memory_space<vmem>>, vector<32x32xbf16>
    tpu.vector_store %arg13[%c32_24, %c32_25], %27 {strides = array<i32>} : memref<96x96xbf16, #tpu.memory_space<vmem>>, vector<32x32xbf16>,
    %c64_26 = arith.constant 64 : index
    %c64_27 = arith.constant 64 : index
    %30 = vector.load %arg13[%c64_26, %c64_27] : memref<96x96xbf16, #tpu.memory_space<vmem>>, vector<32x32xbf16>
    tpu.vector_store %arg13[%c64_26, %c64_27], %27 {strides = array<i32>} : memref<96x96xbf16, #tpu.memory_space<vmem>>, vector<32x32xbf16>,
    %31 = arith.index_cast %c1_i32 : i32 to index
    %c0_28 = arith.constant 0 : index
    %c0_29 = arith.constant 0 : index
    %32 = vector.load %arg7[%31, %c0_28, %c0_29] : memref<2x32x32xbf16, #tpu.memory_space<vmem>>, vector<1x32x32xbf16>
    %33 = vector.shape_cast %32 : vector<1x32x32xbf16> to vector<32x32xbf16>
    %34 = arith.index_cast %c1_i32 : i32 to index
    %c0_30 = arith.constant 0 : index
    %c0_31 = arith.constant 0 : index
    %35 = vector.load %arg6[%34, %c0_30, %c0_31] : memref<2x32x96xbf16, #tpu.memory_space<vmem>>, vector<1x32x96xbf16>
    %36 = vector.shape_cast %35 : vector<1x32x96xbf16> to vector<32x96xbf16>
    %cst_32 = arith.constant dense<0.000000e+00> : vector<32x96xf32>
    %37 = tpu.matmul %33, %36, %cst_32 {dimension_numbers = #tpu.dot_dimension_numbers<[1], [0], [0], [1], [0, 0, 1, 1], [], []>} : vector<32x32xbf16>, vector<32x96xbf16>, vector<32x96xf32> -> vector<32x96xf32>
    %38 = arith.truncf %37 : vector<32x96xf32> to vector<32x96xbf16>
    %c0_33 = arith.constant 0 : index
    %c0_34 = arith.constant 0 : index
    %39 = vector.load %arg13[%c0_33, %c0_34] : memref<96x96xbf16, #tpu.memory_space<vmem>>, vector<96x96xbf16>
    %cst_35 = arith.constant dense<0.000000e+00> : vector<32x96xf32>
    %40 = tpu.matmul %38, %39, %cst_35 {dimension_numbers = #tpu.dot_dimension_numbers<[1], [0], [0], [1], [0, 0, 1, 1], [], []>} : vector<32x96xbf16>, vector<96x96xbf16>, vector<32x96xf32> -> vector<32x96xf32>
    %41 = arith.truncf %40 : vector<32x96xf32> to vector<32x96xbf16>
    %42 = arith.index_cast %c1_i32 : i32 to index
    %c0_36 = arith.constant 0 : index
    %c0_37 = arith.constant 0 : index
    %43 = vector.load %arg15[%42, %c0_36, %c0_37] : memref<2x32x96xbf16, #tpu.memory_space<vmem>>, vector<1x32x96xbf16>
    %44 = vector.shape_cast %43 : vector<1x32x96xbf16> to vector<32x96xbf16>
    %45 = vector.shape_cast %41 : vector<32x96xbf16> to vector<1x32x96xbf16>
    tpu.vector_store %arg15[%42, %c0_36, %c0_37], %45 {strides = array<i32>} : memref<2x32x96xbf16, #tpu.memory_space<vmem>>, vector<1x32x96xbf16>,
    %c2_i32 = arith.constant 2 : i32
    %c0_38 = arith.constant 0 : index
    %c0_39 = arith.constant 0 : index
    %c0_40 = arith.constant 0 : index
    %46 = vector.load %arg2[%c0_38, %c0_39, %c0_40] : memref<2x1x1xf32, #tpu.memory_space<vmem>>, vector<2x1x1xf32>
    %c0_41 = arith.constant 0 : index
    %c0_42 = arith.constant 0 : index
    %c0_43 = arith.constant 0 : index
    %47 = vector.load %arg3[%c0_41, %c0_42, %c0_43] : memref<2x1x1xf32, #tpu.memory_space<vmem>>, vector<2x1x1xf32>
    %c0_44 = arith.constant 0 : index
    %c0_45 = arith.constant 0 : index
    %c0_46 = arith.constant 0 : index
    %48 = vector.load %arg4[%c0_44, %c0_45, %c0_46] : memref<2x1x1xf32, #tpu.memory_space<vmem>>, vector<2x1x1xf32>
    %c0_47 = arith.constant 0 : index
    %c0_48 = arith.constant 0 : index
    %c0_49 = arith.constant 0 : index
    %49 = vector.load %arg5[%c0_47, %c0_48, %c0_49] : memref<2x1x1xf32, #tpu.memory_space<vmem>>, vector<2x1x1xf32>
    %c0_50 = arith.constant 0 : index
    %c0_51 = arith.constant 0 : index
    %c0_52 = arith.constant 0 : index
    %50 = vector.load %arg15[%c0_50, %c0_51, %c0_52] : memref<2x32x96xbf16, #tpu.memory_space<vmem>>, vector<2x32x96xbf16>
    %51 = arith.extf %50 : vector<2x32x96xbf16> to vector<2x32x96xf32>
    %52 = vector.broadcast %46 : vector<2x1x1xf32> to vector<2x32x96xf32>
    %53 = arith.mulf %51, %52 : vector<2x32x96xf32>
    %cst_53 = arith.constant 5.000000e-01 : f32
    %54 = vector.broadcast %cst_53 : f32 to vector<2x1x1xf32>
    %55 = arith.mulf %54, %46 : vector<2x1x1xf32>
    %56 = vector.broadcast %55 : vector<2x1x1xf32> to vector<2x32x96xf32>
    %57 = arith.addf %53, %56 : vector<2x32x96xf32>
    %cst_54 = arith.constant 0.000000e+00 : f32
    %cst_55 = arith.constant 1.000000e+00 : f32
    %58 = vector.broadcast %cst_54 : f32 to vector<2x32x96xf32>
    %59 = arith.maximumf %58, %57 : vector<2x32x96xf32>
    %60 = vector.broadcast %cst_55 : f32 to vector<2x32x96xf32>
    %61 = arith.minimumf %60, %59 : vector<2x32x96xf32>
    %62 = tpu.iota {dimensions = array<i32: 2>} : vector<1x1x96xi32>
    %c32_i32 = arith.constant 32 : i32
    %63 = vector.broadcast %c32_i32 : i32 to vector<1x1x96xi32>
    %64 = arith.cmpi slt, %62, %63 : vector<1x1x96xi32>
    %c64_i32 = arith.constant 64 : i32
    %65 = vector.broadcast %c64_i32 : i32 to vector<1x1x96xi32>
    %66 = arith.cmpi slt, %62, %65 : vector<1x1x96xi32>
    %cst_56 = arith.constant 5.870000e-01 : f32
    %cst_57 = arith.constant 1.140000e-01 : f32
    %67 = vector.broadcast %cst_56 : f32 to vector<1x1x96xf32>
    %68 = vector.broadcast %cst_57 : f32 to vector<1x1x96xf32>
    %69 = arith.select %66, %67, %68 : vector<1x1x96xi1>, vector<1x1x96xf32>
    %cst_58 = arith.constant 2.989000e-01 : f32
    %70 = vector.broadcast %cst_58 : f32 to vector<1x1x96xf32>
    %71 = arith.select %64, %70, %69 : vector<1x1x96xi1>, vector<1x1x96xf32>
    %72 = vector.broadcast %71 : vector<1x1x96xf32> to vector<2x32x96xf32>
    %73 = arith.mulf %61, %72 : vector<2x32x96xf32>
    %cst_59 = arith.constant dense<0.000000e+00> : vector<2x32xf32>
    %74 = vector.multi_reduction <add>, %73, %cst_59 [2] : vector<2x32x96xf32> to vector<2x32xf32>
    %75 = vector.shape_cast %74 : vector<2x32xf32> to vector<2x32x1xf32>
    %cst_60 = arith.constant dense<0.000000e+00> : vector<2x1xf32>
    %76 = vector.multi_reduction <add>, %75, %cst_60 [1] : vector<2x32x1xf32> to vector<2x1xf32>
    %77 = vector.shape_cast %76 : vector<2x1xf32> to vector<2x1x1xf32>
    %cst_61 = arith.constant 9.765625E-4 : f32
    %78 = vector.broadcast %cst_61 : f32 to vector<2x1x1xf32>
    %79 = arith.mulf %77, %78 : vector<2x1x1xf32>
    %80 = vector.broadcast %47 : vector<2x1x1xf32> to vector<2x32x96xf32>
    %81 = arith.mulf %80, %61 : vector<2x32x96xf32>
    %cst_62 = arith.constant 1.000000e+00 : f32
    %82 = vector.broadcast %cst_62 : f32 to vector<2x1x1xf32>
    %83 = arith.subf %82, %47 : vector<2x1x1xf32>
    %84 = arith.mulf %83, %79 : vector<2x1x1xf32>
    %85 = vector.broadcast %84 : vector<2x1x1xf32> to vector<2x32x96xf32>
    %86 = arith.addf %81, %85 : vector<2x32x96xf32>
    %cst_63 = arith.constant 0.000000e+00 : f32
    %cst_64 = arith.constant 1.000000e+00 : f32
    %87 = vector.broadcast %cst_63 : f32 to vector<2x32x96xf32>
    %88 = arith.maximumf %87, %86 : vector<2x32x96xf32>
    %89 = vector.broadcast %cst_64 : f32 to vector<2x32x96xf32>
    %90 = arith.minimumf %89, %88 : vector<2x32x96xf32>
    %c0_65 = arith.constant 0 : index
    %c0_66 = arith.constant 0 : index
    %91 = vector.load %arg11[%c0_65, %c0_66] : memref<96x96xbf16, #tpu.memory_space<vmem>>, vector<96x96xbf16>
    %92 = vector.shape_cast %90 : vector<2x32x96xf32> to vector<64x96xf32>
    %93 = arith.truncf %92 : vector<64x96xf32> to vector<64x96xbf16>
    %cst_67 = arith.constant dense<0.000000e+00> : vector<64x96xf32>
    %94 = tpu.matmul %93, %91, %cst_67 {dimension_numbers = #tpu.dot_dimension_numbers<[1], [0], [0], [1], [0, 0, 1, 1], [], []>} : vector<64x96xbf16>, vector<96x96xbf16>, vector<64x96xf32> -> vector<64x96xf32>
    %95 = vector.shape_cast %94 : vector<64x96xf32> to vector<2x32x96xf32>
    %96 = vector.broadcast %48 : vector<2x1x1xf32> to vector<2x32x96xf32>
    %97 = arith.mulf %96, %90 : vector<2x32x96xf32>
    %cst_68 = arith.constant 1.000000e+00 : f32
    %98 = vector.broadcast %cst_68 : f32 to vector<2x1x1xf32>
    %99 = arith.subf %98, %48 : vector<2x1x1xf32>
    %100 = vector.broadcast %99 : vector<2x1x1xf32> to vector<2x32x96xf32>
    %101 = arith.mulf %100, %95 : vector<2x32x96xf32>
    %102 = arith.addf %97, %101 : vector<2x32x96xf32>
    %cst_69 = arith.constant 0.000000e+00 : f32
    %cst_70 = arith.constant 1.000000e+00 : f32
    %103 = vector.broadcast %cst_69 : f32 to vector<2x32x96xf32>
    %104 = arith.maximumf %103, %102 : vector<2x32x96xf32>
    %105 = vector.broadcast %cst_70 : f32 to vector<2x32x96xf32>
    %106 = arith.minimumf %105, %104 : vector<2x32x96xf32>
    %107 = vector.shape_cast %106 : vector<2x32x96xf32> to vector<64x96xf32>
    %108 = arith.truncf %107 : vector<64x96xf32> to vector<64x96xbf16>
    %cst_71 = arith.constant dense<0.000000e+00> : vector<64x96xf32>
    %109 = tpu.matmul %108, %91, %cst_71 {dimension_numbers = #tpu.dot_dimension_numbers<[1], [0], [0], [1], [0, 0, 1, 1], [], []>} : vector<64x96xbf16>, vector<96x96xbf16>, vector<64x96xf32> -> vector<64x96xf32>
    %110 = vector.shape_cast %109 : vector<64x96xf32> to vector<2x32x96xf32>
    %111 = vector.broadcast %49 : vector<2x1x1xf32> to vector<2x32x96xf32>
    %112 = arith.mulf %111, %110 : vector<2x32x96xf32>
    %cst_72 = arith.constant 1.000000e+00 : f32
    %113 = vector.broadcast %cst_72 : f32 to vector<2x1x1xf32>
    %114 = arith.subf %113, %49 : vector<2x1x1xf32>
    %115 = vector.broadcast %114 : vector<2x1x1xf32> to vector<2x32x96xf32>
    %116 = arith.mulf %115, %106 : vector<2x32x96xf32>
    %117 = arith.addf %112, %116 : vector<2x32x96xf32>
    %118 = arith.truncf %117 : vector<2x32x96xf32> to vector<2x32x96xbf16>
    %c0_73 = arith.constant 0 : index
    %c0_74 = arith.constant 0 : index
    %c0_75 = arith.constant 0 : index
    %119 = vector.load %arg15[%c0_73, %c0_74, %c0_75] : memref<2x32x96xbf16, #tpu.memory_space<vmem>>, vector<2x32x96xbf16>
    tpu.vector_store %arg15[%c0_73, %c0_74, %c0_75], %118 {strides = array<i32>} : memref<2x32x96xbf16, #tpu.memory_space<vmem>>, vector<2x32x96xbf16>,
    %c0_i32_76 = arith.constant 0 : i32
    %120 = arith.index_cast %c0_i32_76 : i32 to index
    %c0_77 = arith.constant 0 : index
    %c0_78 = arith.constant 0 : index
    %121 = vector.load %arg10[%120, %c0_77, %c0_78] : memref<2x32x32xbf16, #tpu.memory_space<vmem>>, vector<1x32x32xbf16>
    %122 = vector.shape_cast %121 : vector<1x32x32xbf16> to vector<32x32xbf16>
    %c0_79 = arith.constant 0 : index
    %c0_80 = arith.constant 0 : index
    %123 = vector.load %arg14[%c0_79, %c0_80] : memref<96x128xbf16, #tpu.memory_space<vmem>>, vector<32x32xbf16>
    tpu.vector_store %arg14[%c0_79, %c0_80], %122 {strides = array<i32>} : memref<96x128xbf16, #tpu.memory_space<vmem>>, vector<32x32xbf16>,
    %c32_81 = arith.constant 32 : index
    %c32_82 = arith.constant 32 : index
    %124 = vector.load %arg14[%c32_81, %c32_82] : memref<96x128xbf16, #tpu.memory_space<vmem>>, vector<32x32xbf16>
    tpu.vector_store %arg14[%c32_81, %c32_82], %122 {strides = array<i32>} : memref<96x128xbf16, #tpu.memory_space<vmem>>, vector<32x32xbf16>,
    %c64_83 = arith.constant 64 : index
    %c64_84 = arith.constant 64 : index
    %125 = vector.load %arg14[%c64_83, %c64_84] : memref<96x128xbf16, #tpu.memory_space<vmem>>, vector<32x32xbf16>
    tpu.vector_store %arg14[%c64_83, %c64_84], %122 {strides = array<i32>} : memref<96x128xbf16, #tpu.memory_space<vmem>>, vector<32x32xbf16>,
    %126 = arith.index_cast %c0_i32_76 : i32 to index
    %c0_85 = arith.constant 0 : index
    %c0_86 = arith.constant 0 : index
    %127 = vector.load %arg9[%126, %c0_85, %c0_86] : memref<2x32x32xbf16, #tpu.memory_space<vmem>>, vector<1x32x32xbf16>
    %128 = vector.shape_cast %127 : vector<1x32x32xbf16> to vector<32x32xbf16>
    %129 = arith.index_cast %c0_i32_76 : i32 to index
    %c0_87 = arith.constant 0 : index
    %c0_88 = arith.constant 0 : index
    %130 = vector.load %arg15[%129, %c0_87, %c0_88] : memref<2x32x96xbf16, #tpu.memory_space<vmem>>, vector<1x32x96xbf16>
    %131 = vector.shape_cast %130 : vector<1x32x96xbf16> to vector<32x96xbf16>
    %cst_89 = arith.constant dense<0.000000e+00> : vector<32x96xf32>
    %132 = tpu.matmul %128, %131, %cst_89 {dimension_numbers = #tpu.dot_dimension_numbers<[1], [0], [0], [1], [0, 0, 1, 1], [], []>} : vector<32x32xbf16>, vector<32x96xbf16>, vector<32x96xf32> -> vector<32x96xf32>
    %133 = arith.truncf %132 : vector<32x96xf32> to vector<32x96xbf16>
    %c0_90 = arith.constant 0 : index
    %c0_91 = arith.constant 0 : index
    %134 = vector.load %arg14[%c0_90, %c0_91] : memref<96x128xbf16, #tpu.memory_space<vmem>>, vector<96x128xbf16>
    %cst_92 = arith.constant dense<0.000000e+00> : vector<32x128xf32>
    %135 = tpu.matmul %133, %134, %cst_92 {dimension_numbers = #tpu.dot_dimension_numbers<[1], [0], [0], [1], [0, 0, 1, 1], [], []>} : vector<32x96xbf16>, vector<96x128xbf16>, vector<32x128xf32> -> vector<32x128xf32>
    %cst_93 = arith.constant 0.000000e+00 : f32
    %cst_94 = arith.constant 1.000000e+00 : f32
    %136 = vector.broadcast %cst_93 : f32 to vector<32x128xf32>
    %137 = arith.maximumf %136, %135 : vector<32x128xf32>
    %138 = vector.broadcast %cst_94 : f32 to vector<32x128xf32>
    %139 = arith.minimumf %138, %137 : vector<32x128xf32>
    %140 = arith.truncf %139 : vector<32x128xf32> to vector<32x128xbf16>
    %141 = arith.index_cast %c0_i32_76 : i32 to index
    %c0_95 = arith.constant 0 : index
    %c0_96 = arith.constant 0 : index
    %142 = vector.load %arg12[%141, %c0_95, %c0_96] : memref<2x32x128xbf16, #tpu.memory_space<vmem>>, vector<1x32x128xbf16>
    %143 = vector.shape_cast %142 : vector<1x32x128xbf16> to vector<32x128xbf16>
    %144 = vector.shape_cast %140 : vector<32x128xbf16> to vector<1x32x128xbf16>
    tpu.vector_store %arg12[%141, %c0_95, %c0_96], %144 {strides = array<i32>} : memref<2x32x128xbf16, #tpu.memory_space<vmem>>, vector<1x32x128xbf16>,
    %c1_i32_97 = arith.constant 1 : i32
    %145 = arith.index_cast %c1_i32_97 : i32 to index
    %c0_98 = arith.constant 0 : index
    %c0_99 = arith.constant 0 : index
    %146 = vector.load %arg10[%145, %c0_98, %c0_99] : memref<2x32x32xbf16, #tpu.memory_space<vmem>>, vector<1x32x32xbf16>
    %147 = vector.shape_cast %146 : vector<1x32x32xbf16> to vector<32x32xbf16>
    %c0_100 = arith.constant 0 : index
    %c0_101 = arith.constant 0 : index
    %148 = vector.load %arg14[%c0_100, %c0_101] : memref<96x128xbf16, #tpu.memory_space<vmem>>, vector<32x32xbf16>
    tpu.vector_store %arg14[%c0_100, %c0_101], %147 {strides = array<i32>} : memref<96x128xbf16, #tpu.memory_space<vmem>>, vector<32x32xbf16>,
    %c32_102 = arith.constant 32 : index
    %c32_103 = arith.constant 32 : index
    %149 = vector.load %arg14[%c32_102, %c32_103] : memref<96x128xbf16, #tpu.memory_space<vmem>>, vector<32x32xbf16>
    tpu.vector_store %arg14[%c32_102, %c32_103], %147 {strides = array<i32>} : memref<96x128xbf16, #tpu.memory_space<vmem>>, vector<32x32xbf16>,
    %c64_104 = arith.constant 64 : index
    %c64_105 = arith.constant 64 : index
    %150 = vector.load %arg14[%c64_104, %c64_105] : memref<96x128xbf16, #tpu.memory_space<vmem>>, vector<32x32xbf16>
    tpu.vector_store %arg14[%c64_104, %c64_105], %147 {strides = array<i32>} : memref<96x128xbf16, #tpu.memory_space<vmem>>, vector<32x32xbf16>,
    %151 = arith.index_cast %c1_i32_97 : i32 to index
    %c0_106 = arith.constant 0 : index
    %c0_107 = arith.constant 0 : index
    %152 = vector.load %arg9[%151, %c0_106, %c0_107] : memref<2x32x32xbf16, #tpu.memory_space<vmem>>, vector<1x32x32xbf16>
    %153 = vector.shape_cast %152 : vector<1x32x32xbf16> to vector<32x32xbf16>
    %154 = arith.index_cast %c1_i32_97 : i32 to index
    %c0_108 = arith.constant 0 : index
    %c0_109 = arith.constant 0 : index
    %155 = vector.load %arg15[%154, %c0_108, %c0_109] : memref<2x32x96xbf16, #tpu.memory_space<vmem>>, vector<1x32x96xbf16>
    %156 = vector.shape_cast %155 : vector<1x32x96xbf16> to vector<32x96xbf16>
    %cst_110 = arith.constant dense<0.000000e+00> : vector<32x96xf32>
    %157 = tpu.matmul %153, %156, %cst_110 {dimension_numbers = #tpu.dot_dimension_numbers<[1], [0], [0], [1], [0, 0, 1, 1], [], []>} : vector<32x32xbf16>, vector<32x96xbf16>, vector<32x96xf32> -> vector<32x96xf32>
    %158 = arith.truncf %157 : vector<32x96xf32> to vector<32x96xbf16>
    %c0_111 = arith.constant 0 : index
    %c0_112 = arith.constant 0 : index
    %159 = vector.load %arg14[%c0_111, %c0_112] : memref<96x128xbf16, #tpu.memory_space<vmem>>, vector<96x128xbf16>
    %cst_113 = arith.constant dense<0.000000e+00> : vector<32x128xf32>
    %160 = tpu.matmul %158, %159, %cst_113 {dimension_numbers = #tpu.dot_dimension_numbers<[1], [0], [0], [1], [0, 0, 1, 1], [], []>} : vector<32x96xbf16>, vector<96x128xbf16>, vector<32x128xf32> -> vector<32x128xf32>
    %cst_114 = arith.constant 0.000000e+00 : f32
    %cst_115 = arith.constant 1.000000e+00 : f32
    %161 = vector.broadcast %cst_114 : f32 to vector<32x128xf32>
    %162 = arith.maximumf %161, %160 : vector<32x128xf32>
    %163 = vector.broadcast %cst_115 : f32 to vector<32x128xf32>
    %164 = arith.minimumf %163, %162 : vector<32x128xf32>
    %165 = arith.truncf %164 : vector<32x128xf32> to vector<32x128xbf16>
    %166 = arith.index_cast %c1_i32_97 : i32 to index
    %c0_116 = arith.constant 0 : index
    %c0_117 = arith.constant 0 : index
    %167 = vector.load %arg12[%166, %c0_116, %c0_117] : memref<2x32x128xbf16, #tpu.memory_space<vmem>>, vector<1x32x128xbf16>
    %168 = vector.shape_cast %167 : vector<1x32x128xbf16> to vector<32x128xbf16>
    %169 = vector.shape_cast %165 : vector<32x128xbf16> to vector<1x32x128xbf16>
    tpu.vector_store %arg12[%166, %c0_116, %c0_117], %169 {strides = array<i32>} : memref<2x32x128xbf16, #tpu.memory_space<vmem>>, vector<1x32x128xbf16>,
    %c2_i32_118 = arith.constant 2 : i32
    return
  }
  func.func @transform_0(%arg0: i32, %arg1: i32) -> (i32, i32, i32) {
    %c1_i32 = arith.constant 1 : i32
    %0 = arith.muli %arg1, %c1_i32 : i32
    %1 = arith.addi %0, %arg0 : i32
    %c0_i32 = arith.constant 0 : i32
    %c0_i32_0 = arith.constant 0 : i32
    %c0_i32_1 = arith.constant 0 : i32
    return %1, %c0_i32, %c0_i32_0 : i32, i32, i32
  }
  func.func @transform_1(%arg0: i32, %arg1: i32) -> (i32, i32, i32) {
    %c1_i32 = arith.constant 1 : i32
    %0 = arith.muli %arg1, %c1_i32 : i32
    %1 = arith.addi %0, %arg0 : i32
    %c0_i32 = arith.constant 0 : i32
    %c0_i32_0 = arith.constant 0 : i32
    %c0_i32_1 = arith.constant 0 : i32
    return %1, %c0_i32, %c0_i32_0 : i32, i32, i32
  }
  func.func @transform_2(%arg0: i32, %arg1: i32) -> (i32, i32, i32) {
    %c1_i32 = arith.constant 1 : i32
    %0 = arith.muli %arg1, %c1_i32 : i32
    %1 = arith.addi %0, %arg0 : i32
    %c0_i32 = arith.constant 0 : i32
    %c0_i32_0 = arith.constant 0 : i32
    %c0_i32_1 = arith.constant 0 : i32
    return %1, %c0_i32, %c0_i32_0 : i32, i32, i32
  }
  func.func @transform_3(%arg0: i32, %arg1: i32) -> (i32, i32, i32) {
    %c1_i32 = arith.constant 1 : i32
    %0 = arith.muli %arg1, %c1_i32 : i32
    %1 = arith.addi %0, %arg0 : i32
    %c0_i32 = arith.constant 0 : i32
    %c0_i32_0 = arith.constant 0 : i32
    %c0_i32_1 = arith.constant 0 : i32
    return %1, %c0_i32, %c0_i32_0 : i32, i32, i32
  }
  func.func @transform_4(%arg0: i32, %arg1: i32) -> (i32, i32, i32) {
    %c0_i32 = arith.constant 0 : i32
    %c0_i32_0 = arith.constant 0 : i32
    %c0_i32_1 = arith.constant 0 : i32
    return %arg0, %c0_i32, %c0_i32_0 : i32, i32, i32
  }
  func.func @transform_5(%arg0: i32, %arg1: i32) -> (i32, i32, i32) {
    %c1_i32 = arith.constant 1 : i32
    %0 = arith.muli %arg1, %c1_i32 : i32
    %1 = arith.addi %0, %arg0 : i32
    %c0_i32 = arith.constant 0 : i32
    %c0_i32_0 = arith.constant 0 : i32
    %c0_i32_1 = arith.constant 0 : i32
    return %1, %c0_i32, %c0_i32_0 : i32, i32, i32
  }
  func.func @transform_6(%arg0: i32, %arg1: i32) -> (i32, i32, i32) {
    %c1_i32 = arith.constant 1 : i32
    %0 = arith.muli %arg1, %c1_i32 : i32
    %1 = arith.addi %0, %arg0 : i32
    %c0_i32 = arith.constant 0 : i32
    %c0_i32_0 = arith.constant 0 : i32
    %c0_i32_1 = arith.constant 0 : i32
    return %1, %c0_i32, %c0_i32_0 : i32, i32, i32
  }
  func.func @transform_7(%arg0: i32, %arg1: i32) -> (i32, i32, i32) {
    %c1_i32 = arith.constant 1 : i32
    %0 = arith.muli %arg1, %c1_i32 : i32
    %1 = arith.addi %0, %arg0 : i32
    %c0_i32 = arith.constant 0 : i32
    %c0_i32_0 = arith.constant 0 : i32
    %c0_i32_1 = arith.constant 0 : i32
    return %1, %c0_i32, %c0_i32_0 : i32, i32, i32
  }
  func.func @transform_8(%arg0: i32, %arg1: i32) -> (i32, i32, i32) {
    %c1_i32 = arith.constant 1 : i32
    %0 = arith.muli %arg1, %c1_i32 : i32
    %1 = arith.addi %0, %arg0 : i32
    %c0_i32 = arith.constant 0 : i32
    %c0_i32_0 = arith.constant 0 : i32
    %c0_i32_1 = arith.constant 0 : i32
    return %1, %c0_i32, %c0_i32_0 : i32, i32, i32
  }
  func.func @transform_9(%arg0: i32, %arg1: i32) -> (i32, i32) {
    %c0_i32 = arith.constant 0 : i32
    %c0_i32_0 = arith.constant 0 : i32
    %c0_i32_1 = arith.constant 0 : i32
    return %c0_i32, %c0_i32_0 : i32, i32
  }
  func.func @transform_10(%arg0: i32, %arg1: i32) -> (i32, i32, i32) {
    %c1_i32 = arith.constant 1 : i32
    %0 = arith.muli %arg1, %c1_i32 : i32
    %1 = arith.addi %0, %arg0 : i32
    %c0_i32 = arith.constant 0 : i32
    %c0_i32_0 = arith.constant 0 : i32
    %c0_i32_1 = arith.constant 0 : i32
    return %1, %c0_i32, %c0_i32_0 : i32, i32, i32
  }
}

</mosaic_0001>

<bundles_post_ra>
// kernel: _augment_pair.95
= control target key start
LH: loop header
LB: loop body
LE: loop exit
PB: predicated region body
PF: predicated region fallthrough
CT: control target
= control target key end

     0   :  { %s2500_s13 = smov 0   ;;  %s2502_s14 = smov 0   ;;  %s2859_s0 = inlined_call_operand.vmem [shape: f32[4,1,1], index: 0, kind: input, shape index: {}]   ;;  %s2860_s1 = inlined_call_operand.vmem [shape: f32[4,1,1], index: 1, kind: input, shape index: {}]   ;;  %s2861_s2 = inlined_call_operand.vmem [shape: f32[4,1,1], index: 2, kind: input, shape index: {}]   ;;  %s2862_s3 = inlined_call_operand.vmem [shape: f32[4,1,1], index: 3, kind: input, shape index: {}]   ;;  %s2863_s4 = inlined_call_operand.vmem [shape: bf16[2,32,96], index: 4, kind: input, shape index: {}]   ;;  %s2864_s5 = inlined_call_operand.vmem [shape: bf16[4,32,32], index: 5, kind: input, shape index: {}]   ;;  %s2865_s6 = inlined_call_operand.vmem [shape: bf16[4,32,32], index: 6, kind: input, shape index: {}]   ;;  %s2866_s7 = inlined_call_operand.vmem [shape: bf16[4,32,32], index: 7, kind: input, shape index: {}]   ;;  %s2867_s8 = inlined_call_operand.vmem [shape: bf16[4,32,32], index: 8, kind: input, shape index: {}]   ;;  %s2868_s9 = inlined_call_operand.vmem [shape: bf16[96,96], index: 9, kind: input, shape index: {}]   ;;  %s2869_s10 = inlined_call_operand.vmem [shape: bf16[4,32,128], index: 10, kind: output, shape index: {}]  }
   0x1   :  { %s2504_s15 = smov 0  }
   0x2 LB: > { %s29_s16 = sadd.s32 1, %s2435_s14  ;;  %p2031_p0 = scmp.ge.s32.totalorder %s2439_s15, 1  ;;  %s2439_s15 = sphi %s2504_s15, %s20_s15   ;;  %s2435_s14 = sphi %s2502_s14, %s2871_s14   ;;  %s2431_s13 = sphi %s2500_s13, %s2870_s13  }
   0x3   : > { %p30_p1 = scmp.ge.s32.totalorder %s29_s16, 2  ;;  %p448_p2 = scmp.lt.s32.totalorder %s2439_s15, 3 }
   0x5   : > { %s2873_s16 = smov (%p30_p1, %s29_s16), 0  ;;  %p449_p3 = pnand %p2031_p0, %p448_p2 }
   0x6   : > { %s2032_s17 = sshll.u32 (!%p449_p3), %s2431_s13, 1  ;;  %s2442_s13 = smov (!%p449_p3), 64  }
   0x7   : > { %452 = sbr.rel (%p449_p3) target bundleno = 1250 (0x4e2), region = 60  ;;  %p539_p4 = scmp.lt.s32.totalorder (!%p449_p3), %s2032_s17, 3 }
   0x8   : > { %s2443_s18 = smov (!%p449_p3), 32  }
   0xc   : > { %vm618_vm0 = vcmask 781312   ;;  %v2293_v0 = vld [vmem:[%s2863_s4 + $0x8] sm:$0xff]  ;;  %v2441_v1 = vmov 0   ;;  %v2303_v2 = vld [vmem:[%s2863_s4 + $0x18] sm:$0xff]  ;;  %v2292_v3 = vld [vmem:[%s2863_s4] sm:$0xff]  ;;  %s2875_s17 = smov (!%p539_p4, %s2032_s17), 3 }
   0xd   : > { %621 = vst.msk [vmem:[#allocation2 + $0x8] sm:$0xf] %vm618_vm0, %v2441_v1  ;;  %2406 = vset.pattern.permute.xlu1 %v2441_v1  ;;  %2408 = vset.pattern.permute.xlu0 %v2441_v1  ;;  %v2302_v4 = vld [vmem:[%s2863_s4 + $0x10] sm:$0xff]  ;;  %s2537_s26 = sshll.u32 %s2875_s17, 4  ;;  %vm647_vm1 = vcmask 257024   ;;  %vm720_vm2 = vcmask 261120   ;;  %s541_s21 = scalar_lea.vmem %s2859_s0, %s2875_s17 }
   0xe   : > { %619 = vst.msk [vmem:[#allocation2] sm:$0xf] %vm618_vm0, %v2441_v1  ;;  %733 = vmatpush.bf16.msra.mxu0 %v2293_v0  ;;  %2407 = vset.pattern.permute.xlu2 %v2441_v1  ;;  %s2544_s29 = scalar_lea.vmem %s2865_s6, %s2537_s26  ;;  %s2551_s12 = scalar_lea.vmem %s2864_s5, %s2537_s26  ;;  %vm668_vm3 = vcmask 519424   ;;  %vm685_vm4 = vcmask 781824   ;;  %v2409_v37 = vld [vmem:[%s541_s21] ss:$0 sm:$0xff] }
   0xf   : > { %620 = vst.msk [vmem:[#allocation2 + $0x4] sm:$0xf] %vm618_vm0, %v2441_v1  ;;  %919 = vmatpush.bf16.msra.mxu2 %v2303_v2  ;;  %v645_v5 = vld [vmem:[%s2544_s29 + $0x8] sm:$0xf]  ;;  %v643_v6 = vld [vmem:[%s2544_s29] sm:$0xf]  ;;  %s2677_s24 = scalar_lea.vmem %s2860_s1, %s2875_s17  ;;  %s2685_s28 = scalar_lea.vmem %s2861_s2, %s2875_s17 }
  0x10   : > { %622 = vst.msk [vmem:[#allocation2 + $0xc] sm:$0xf] %vm618_vm0, %v2441_v1  ;;  %677 = vrot.lane.b32.xlu0 %v645_v5, %s2442_s13  ;;  %673 = vrot.lane.b32.xlu1 %v643_v6, %s2442_s13  ;;  %v2290_v7 = vld [vmem:[%s2551_s12] sm:$0xff]  ;;  %v2300_v8 = vld [vmem:[%s2551_s12 + $0x10] sm:$0xff]  ;;  %vm796_vm5 = vcmask 785408   ;;  %s2693_s11 = scalar_lea.vmem %s2862_s3, %s2875_s17  ;;  %s2759_s17 = scalar_lea.vmem %s2867_s8, %s2537_s26 }
  0x11   : > { %623 = vst.msk [vmem:[#allocation2 + $0x10] sm:$0xf] %vm618_vm0, %v2441_v1  ;;  %660 = vrot.lane.b32.xlu2 %v645_v5, %s2443_s18  ;;  %v646_v9 = vld [vmem:[%s2544_s29 + $0xc] sm:$0xf]  ;;  %v644_v10 = vld [vmem:[%s2544_s29 + $0x4] sm:$0xf]  ;;  %s2787_s20 = scalar_lea.vmem %s2866_s7, %s2537_s26 }
  0x12   : > { %624 = vst.msk [vmem:[#allocation2 + $0x14] sm:$0xf] %vm618_vm0, %v2441_v1  ;;  %734 = vmatpush.bf16.msra.mxu0 %v2292_v3  ;;  %v2291_v11 = vld [vmem:[%s2551_s12 + $0x8] sm:$0xff]  ;;  %v2301_v12 = vld [vmem:[%s2551_s12 + $0x18] sm:$0xff]  ;;  %v2095_v15 = vld [vmem:[%s2544_s29 + $0x10] sm:$0xf] }
  0x13   : > { %625 = vst.msk [vmem:[#allocation2 + $0x18] sm:$0xf] %vm618_vm0, %v2441_v1  ;;  %920 = vmatpush.bf16.msra.mxu2 %v2302_v4  ;;  %v2097_v13 = vld [vmem:[%s2544_s29 + $0x18] sm:$0xf]  ;;  %v2098_v14 = vld [vmem:[%s2544_s29 + $0x1c] sm:$0xf] }
  0x14   : > { %650 = vst.msk [vmem:[#allocation2 + $0x8] sm:$0xf] %vm647_vm1, %v645_v5  ;;  %v2096_v16 = vld [vmem:[%s2544_s29 + $0x14] sm:$0xf]  ;;  %v1016_v48 = vld [vmem:[%s541_s21] sm:$0x1]  ;;  %v1098_v5 = vlaneseq }
  0x15   : > { %626 = vst.msk [vmem:[#allocation2 + $0x1c] sm:$0xf] %vm618_vm0, %v2441_v1  ;;  %2067 = vmatmul.msk.bf16.vlgmr.msra.gmra.mxu0 %vm720_vm2, %v2290_v7  ;;  %v1017_v49 = vld [vmem:[%s541_s21 + $0x1] sm:$0x1]  ;;  %v1060_v51 = vmul.f32 0.5, %v1016_v48 }
  0x16   : > { %627 = vst.msk [vmem:[#allocation2 + $0x20] sm:$0xf] %vm618_vm0, %v2441_v1  ;;  %2123 = vmatmul.msk.bf16.vlgmr.msra.gmra.mxu2 %vm720_vm2, %v2300_v8  ;;  %v2410_v50 = vld [vmem:[%s541_s21 + $0x1] ss:$0 sm:$0xff]  ;;  %v1061_v52 = vmul.f32 0.5, %v1017_v49  ;;  %v1099_v7 = vand.u32 127, %v1098_v5  ;;  %s614_s21 = scalar_lea.vmem %s2869_s10, %s2537_s26 }
  0x17   : > { %628 = vst.msk [vmem:[#allocation2 + $0x24] sm:$0xf] %vm618_vm0, %v2441_v1  ;;  %v1064_v53 = vperm.slane %v1060_v51, 0 }
  0x18   : > { %629 = vst.msk [vmem:[#allocation2 + $0x28] sm:$0xf] %vm618_vm0, %v2441_v1  ;;  %679 = vrot.lane.b32.xlu0 %v646_v9, %s2442_s13  ;;  %675 = vrot.lane.b32.xlu1 %v644_v10, %s2442_s13  ;;  %v1065_v55 = vperm.slane %v1061_v52, 0  ;;  %vm1101_vm6 = vcmp.lt.s32.totalorder %v1099_v7, 64  ;;  %vm1100_vm7 = vcmp.lt.s32.totalorder %v1099_v7, 32 }
  0x19   : > { %630 = vst.msk [vmem:[#allocation2 + $0x2c] sm:$0xf] %vm618_vm0, %v2441_v1  ;;  %662 = vrot.lane.b32.xlu2 %v646_v9, %s2443_s18 }
  0x1a   : > { %631 = vst [vmem:[#allocation3] sm:$0xf] %v2441_v1 }
  0x1b   : > { %632 = vst [vmem:[#allocation3 + $0x4] sm:$0xf] %v2441_v1 }
  0x1c   : > { %633 = vst [vmem:[#allocation3 + $0x8] sm:$0xf] %v2441_v1 }
  0x1d   : > { %634 = vst [vmem:[#allocation3 + $0xc] sm:$0xf] %v2441_v1 }
  0x1e   : > { %635 = vst [vmem:[#allocation3 + $0x10] sm:$0xf] %v2441_v1 }
  0x1f   : > { %636 = vst [vmem:[#allocation3 + $0x14] sm:$0xf] %v2441_v1 }
  0x20   : > { %637 = vst [vmem:[#allocation3 + $0x18] sm:$0xf] %v2441_v1  ;;  %656 = vrot.lane.b32.xlu0 %v643_v6, %s2443_s18  ;;  %658 = vrot.lane.b32.xlu1 %v644_v10, %s2443_s18 }
  0x21   : > { %638 = vst [vmem:[#allocation3 + $0x1c] sm:$0xf] %v2441_v1  ;;  %863 = vrot.lane.b32.xlu2 %v2097_v13, %s2442_s13 }
  0x22   : > { %639 = vst [vmem:[#allocation3 + $0x20] sm:$0xf] %v2441_v1 }
  0x23   : > { %640 = vst [vmem:[#allocation3 + $0x24] sm:$0xf] %v2441_v1 }
  0x24   : > { %641 = vst [vmem:[#allocation3 + $0x28] sm:$0xf] %v2441_v1 }
  0x25   : > { %642 = vst [vmem:[#allocation3 + $0x2c] sm:$0xf] %v2441_v1  ;;  %2068 = vmatmul.msk.bf16.gmra.mxu0 %vm720_vm2, %v2291_v11 }
  0x26   : > { %648 = vst.msk [vmem:[#allocation2] sm:$0xf] %vm647_vm1, %v643_v6  ;;  %2124 = vmatmul.msk.bf16.gmra.mxu2 %vm720_vm2, %v2301_v12 }
  0x27   : > { %651 = vst.msk [vmem:[#allocation2 + $0xc] sm:$0xf] %vm647_vm1, %v646_v9 }
  0x28   : > { %649 = vst.msk [vmem:[#allocation2 + $0x4] sm:$0xf] %vm647_vm1, %v644_v10  ;;  %865 = vrot.lane.b32.xlu0 %v2098_v14, %s2442_s13  ;;  %859 = vrot.lane.b32.xlu1 %v2095_v15, %s2442_s13 }
  0x29   : > { %837 = vst.msk [vmem:[#allocation2 + $0x8] sm:$0xf] %vm647_vm1, %v2097_v13  ;;  %861 = vrot.lane.b32.xlu2 %v2096_v16, %s2442_s13 }
  0x2a   : > { %835 = vst.msk [vmem:[#allocation2] sm:$0xf] %vm647_vm1, %v2095_v15 }
  0x30   : > { %847 = vrot.lane.b32.xlu0 %v2097_v13, %s2443_s18  ;;  %849 = vrot.lane.b32.xlu1 %v2098_v14, %s2443_s18  ;;  %v2295_v22 = vld [vmem:[#allocation2 + $0x8] sm:$0xff] }
  0x31   : > { %843 = vrot.lane.b32.xlu2 %v2095_v15, %s2443_s18  ;;  %838 = vst.msk [vmem:[#allocation2 + $0xc] sm:$0xf] %vm647_vm1, %v2098_v14  ;;  %v2294_v23 = vld [vmem:[#allocation2] sm:$0xff] }
  0x32   : > { %836 = vst.msk [vmem:[#allocation2 + $0x4] sm:$0xf] %vm647_vm1, %v2096_v16 }
  0x38   : > { %845 = vrot.lane.b32.xlu0 %v2096_v16, %s2443_s18  ;;  %1045 = vperm.xlu1 %2406, %v2409_v37   ;;  %v2305_v57 = vld [vmem:[#allocation2 + $0x8] sm:$0xff] }
  0x39   : > { %1067 = vperm.xlu2 %2407, %v1064_v53   ;;  %v2304_v60 = vld [vmem:[#allocation2] sm:$0xff] }
  0x40   : > { %1049 = vperm.xlu0 %2408, %v2410_v50   ;;  %1071 = vperm.xlu1 %2406, %v1065_v55  }
  0x6b   : > { %v661_v17 = vpop.permute.xlu2 %660 }
  0x6c   : > { %671 = vst.msk [vmem:[#allocation2 + $0x18] sm:$0xf] %vm668_vm3, %v661_v17  ;;  %v2444_v17 = vmov 0.114  }
  0x73   : > { %v663_v18 = vpop.permute.xlu2 %662 }
  0x74   : > { %672 = vst.msk [vmem:[#allocation2 + $0x1c] sm:$0xf] %vm668_vm3, %v663_v18  ;;  %v1102_v18 = vsel %vm1101_vm6, 0.587, %v2444_v17 }
  0x7b   : > { %v864_v19 = vpop.permute.xlu2 %863  ;;  %v2297_v35 = vld [vmem:[#allocation2 + $0x18] sm:$0xff] }
  0x82   : > { %v678_v20 = vpop.permute.xlu0 %677  ;;  %v674_v21 = vpop.permute.xlu1 %673 }
  0x83   : > { %688 = vst.msk [vmem:[#allocation2 + $0x28] sm:$0xf] %vm685_vm4, %v678_v20  ;;  %v862_v26 = vpop.permute.xlu2 %861 }
  0x84   : > { %686 = vst.msk [vmem:[#allocation2 + $0x20] sm:$0xf] %vm685_vm4, %v674_v21 }
  0x85   : > { %873 = vst.msk [vmem:[#allocation2 + $0x28] sm:$0xf] %vm685_vm4, %v864_v19 }
  0x8a   : > { %v680_v24 = vpop.permute.xlu0 %679  ;;  %v676_v25 = vpop.permute.xlu1 %675 }
  0x8b   : > { %689 = vst.msk [vmem:[#allocation2 + $0x2c] sm:$0xf] %vm685_vm4, %v680_v24  ;;  %v844_v30 = vpop.permute.xlu2 %843 }
  0x8c   : > { %687 = vst.msk [vmem:[#allocation2 + $0x24] sm:$0xf] %vm685_vm4, %v676_v25  ;;  %v2626_v25 = vsel %vm1100_vm7, 0.2989, %v1102_v18 }
  0x92   : > { %v657_v27 = vpop.permute.xlu0 %656  ;;  %v659_v28 = vpop.permute.xlu1 %658  ;;  %v2299_v29 = vld [vmem:[#allocation2 + $0x28] sm:$0xff] }
  0x93   : > { %669 = vst.msk [vmem:[#allocation2 + $0x10] sm:$0xf] %vm668_vm3, %v657_v27  ;;  %805 = vmatpush.bf16.msra.mxu1 %v2299_v29  ;;  %v2298_v31 = vld [vmem:[#allocation2 + $0x20] sm:$0xff]  ;;  %v736_v32 = vpop.f32.mrf.mxu0  ;;  %v1068_v13 = vpop.permute.xlu2 %1067 }
  0x94   : > { %670 = vst.msk [vmem:[#allocation2 + $0x14] sm:$0xf] %vm668_vm3, %v659_v28 }
  0x95   : > { %872 = vst.msk [vmem:[#allocation2 + $0x24] sm:$0xf] %vm685_vm4, %v862_v26 }
  0x96   : > { %855 = vst.msk [vmem:[#allocation2 + $0x10] sm:$0xf] %vm668_vm3, %v844_v30 }
  0x97   : > { %806 = vmatpush.bf16.msra.mxu1 %v2298_v31 }
  0x99   : > { %v922_v47 = vpop.f32.mrf.mxu2 }
  0x9a   : > { %v866_v33 = vpop.permute.xlu0 %865  ;;  %v860_v34 = vpop.permute.xlu1 %859 }
  0x9b   : > { %874 = vst.msk [vmem:[#allocation2 + $0x2c] sm:$0xf] %vm685_vm4, %v866_v33  ;;  %807 = vmatpush.bf16.msra.mxu1 %v2297_v35  ;;  %v738_v38 = vpop.f32.mrf.mxu0 }
  0x9c   : > { %871 = vst.msk [vmem:[#allocation2 + $0x20] sm:$0xf] %vm685_vm4, %v860_v34  ;;  %v746_v43 = vpack.c.bf16 %v738_v38, %v736_v32 }
  0x9d   : > { %v2296_v36 = vld [vmem:[#allocation2 + $0x10] sm:$0xff] }
  0x9f   : > { %808 = vmatpush.bf16.msra.mxu1 %v2296_v36 }
  0xa1   : > { %v924_v58 = vpop.f32.mrf.mxu2 }
  0xa2   : > { %v848_v39 = vpop.permute.xlu0 %847  ;;  %v850_v40 = vpop.permute.xlu1 %849  ;;  %v2309_v41 = vld [vmem:[#allocation2 + $0x28] sm:$0xff]  ;;  %v932_v61 = vpack.c.bf16 %v924_v58, %v922_v47 }
  0xa3   : > { %857 = vst.msk [vmem:[#allocation2 + $0x18] sm:$0xf] %vm668_vm3, %v848_v39  ;;  %809 = vmatpush.bf16.msra.mxu1 %v2295_v22  ;;  %990 = vmatpush.bf16.msra.mxu3 %v2309_v41  ;;  %v2308_v42 = vld [vmem:[#allocation2 + $0x20] sm:$0xff]  ;;  %v741_v45 = vpop.f32.mrf.mxu0 }
  0xa4   : > { %858 = vst.msk [vmem:[#allocation2 + $0x1c] sm:$0xf] %vm668_vm3, %v850_v40 }
  0xa7   : > { %810 = vmatpush.bf16.msra.mxu1 %v2294_v23  ;;  %991 = vmatpush.bf16.msra.mxu3 %v2308_v42 }
  0xa9   : > { %v927_v62 = vpop.f32.mrf.mxu2 }
  0xaa   : > { %v846_v44 = vpop.permute.xlu0 %845  ;;  %2093 = vmatmul.msk.bf16.vlgmr.msra.gmra.mxu1 %vm796_vm5, %v746_v43  ;;  %v1046_v10 = vpop.permute.xlu1 %1045 }
  0xab   : > { %856 = vst.msk [vmem:[#allocation2 + $0x14] sm:$0xf] %vm668_vm3, %v846_v44  ;;  %v2307_v46 = vld [vmem:[#allocation2 + $0x18] sm:$0xff]  ;;  %v743_v56 = vpop.f32.mrf.mxu0 }
  0xac   : > { %992 = vmatpush.bf16.msra.mxu3 %v2307_v46  ;;  %v747_v59 = vpack.c.bf16 %v743_v56, %v741_v45 }
  0xb1   : > { %v929_v63 = vpop.f32.mrf.mxu2 }
  0xb2   : > { %v2306_v54 = vld [vmem:[#allocation2 + $0x10] sm:$0xff]  ;;  %v933_v0 = vpack.c.bf16 %v929_v63, %v927_v62  ;;  %v1050_v49 = vpop.permute.xlu0 %1049  ;;  %v1072_v58 = vpop.permute.xlu1 %1071 }
  0xb3   : > { %993 = vmatpush.bf16.msra.mxu3 %v2306_v54 }
  0xb7   : > { %994 = vmatpush.bf16.msra.mxu3 %v2305_v57 }
  0xba   : > { %2094 = vmatmul.msk.bf16.gmra.mxu1 %vm796_vm5, %v747_v59 }
  0xbb   : > { %995 = vmatpush.bf16.msra.mxu3 %v2304_v60 }
  0xbe   : > { %2149 = vmatmul.msk.bf16.vlgmr.msra.gmra.mxu3 %vm796_vm5, %v932_v61 }
  0xce   : > { %2150 = vmatmul.msk.bf16.gmra.mxu3 %vm796_vm5, %v933_v0 }
 0x127   : > { %v812_v1 = vpop.f32.mrf.mxu1 }
 0x128   : > { %v822_v2 = vpack.c.bf16 %v812_v1, %v812_v1 }
 0x12a   : > { %826 = vst.msk [vmem:[#allocation4] sm:$0xf] %vm618_vm0, %v822_v2 }
 0x12f   : > { %v814_v3 = vpop.f32.mrf.mxu1 }
 0x130   : > { %v823_v4 = vpack.c.bf16 %v814_v3, %v814_v3 }
 0x132   : > { %827 = vst.msk [vmem:[#allocation4 + $0x4] sm:$0xf] %vm618_vm0, %v823_v4 }
 0x137   : > { %v817_v6 = vpop.f32.mrf.mxu1 }
 0x138   : > { %v824_v8 = vpack.c.bf16 %v817_v6, %v817_v6 }
 0x139   : > { %v2337_v9 = vld [vmem:[#allocation4] sm:$0xff]  }
 0x13a   : > { %828 = vst.msk [vmem:[#allocation4 + $0x8] sm:$0xf] %vm618_vm0, %v824_v8  ;;  %v2338_v11 = vunpack.c.l.bf16 %v2337_v9  ;;  %v2339_v12 = vunpack.c.h.bf16 %v2337_v9 }
 0x13c   : > { %v1052_v14 = vmul.f32 %v2338_v11, %v1046_v10  ;;  %v1053_v15 = vmul.f32 %v2339_v12, %v1046_v10 }
 0x13e   : > { %v1075_v16 = vadd.f32 %v1068_v13, %v1053_v15  ;;  %v1074_v19 = vadd.f32 %v1068_v13, %v1052_v14 }
 0x13f   : > { %v819_v20 = vpop.f32.mrf.mxu1 }
 0x140   : > { %v825_v21 = vpack.c.bf16 %v819_v20, %v819_v20  ;;  %v1083_v22 = vmax.f32 %v1075_v16, 0.0  ;;  %v1082_v23 = vmax.f32 %v1074_v19, 0.0 }
 0x141   : > { %v997_v24 = vpop.f32.mrf.mxu3 }
 0x142   : > { %829 = vst.msk [vmem:[#allocation4 + $0xc] sm:$0xf] %vm618_vm0, %v825_v21  ;;  %v1007_v26 = vpack.c.bf16 %v997_v24, %v997_v24  ;;  %v2629_v27 = vmin.f32 %v1083_v22, 1.0  ;;  %v2631_v28 = vmin.f32 %v1082_v23, 1.0  ;;  %v2411_v22 = vld [vmem:[%s2677_s24] ss:$0 sm:$0xff] }
 0x143   : > { %v2412_v23 = vld [vmem:[%s2677_s24 + $0x1] ss:$0 sm:$0xff]  ;;  %v2413_v24 = vld [vmem:[%s2685_s28] ss:$0 sm:$0xff] }
 0x144   : > { %1012 = vst.msk [vmem:[#allocation4 + $0x10] sm:$0xf] %vm618_vm0, %v1007_v26  ;;  %v1105_v29 = vmul.f32 %v2626_v25, %v2629_v27  ;;  %v1104_v30 = vmul.f32 %v2626_v25, %v2631_v28 }
 0x146   : > { %v1115_v31 = vsel %vm796_vm5, %v1105_v29, 0.0  ;;  %v1112_v32 = vsel %vm796_vm5, %v1104_v30, 0.0  ;;  %v2414_v30 = vld [vmem:[%s2693_s11 + $0x1] ss:$0 sm:$0xff] }
 0x147   : > { %1116 = vadd.xlane.f32.xlu1 %v1115_v31  ;;  %1113 = vadd.xlane.f32.xlu2 %v1112_v32 }
 0x149   : > { %v999_v33 = vpop.f32.mrf.mxu3  ;;  %v2372_v34 = vld [vmem:[#allocation4 + $0x8] sm:$0xff]  }
 0x14a   : > { %v1008_v35 = vpack.c.bf16 %v999_v33, %v999_v33  ;;  %v2342_v36 = vunpack.c.l.bf16 %v2372_v34  ;;  %v2343_v37 = vunpack.c.h.bf16 %v2372_v34 }
 0x14c   : > { %1013 = vst.msk [vmem:[#allocation4 + $0x14] sm:$0xf] %vm618_vm0, %v1008_v35  ;;  %v1054_v38 = vmul.f32 %v2342_v36, %v1046_v10  ;;  %v1055_v39 = vmul.f32 %v2343_v37, %v1046_v10 }
 0x14e   : > { %v1076_v40 = vadd.f32 %v1068_v13, %v1054_v38  ;;  %v1077_v41 = vadd.f32 %v1068_v13, %v1055_v39 }
 0x150   : > { %v1084_v42 = vmax.f32 %v1076_v40, 0.0  ;;  %v1085_v43 = vmax.f32 %v1077_v41, 0.0 }
 0x151   : > { %v1002_v44 = vpop.f32.mrf.mxu3 }
 0x152   : > { %v1009_v45 = vpack.c.bf16 %v1002_v44, %v1002_v44  ;;  %v2641_v46 = vmin.f32 %v1084_v42, 1.0  ;;  %v2643_v47 = vmin.f32 %v1085_v43, 1.0  ;;  %v1018_v42 = vld [vmem:[%s2677_s24] sm:$0x1] }
 0x153   : > { %v2373_v48 = vld [vmem:[#allocation4 + $0x10] sm:$0xff]   ;;  %v1176_v44 = vsub.f32 1.0, %v1018_v42 }
 0x154   : > { %1014 = vst.msk [vmem:[#allocation4 + $0x18] sm:$0xf] %vm618_vm0, %v1009_v45  ;;  %v2346_v50 = vunpack.c.l.bf16 %v2373_v48  ;;  %v2347_v51 = vunpack.c.h.bf16 %v2373_v48  ;;  %v1106_v52 = vmul.f32 %v2626_v25, %v2641_v46  ;;  %v1107_v53 = vmul.f32 %v2626_v25, %v2643_v47 }
 0x156   : > { %v1056_v54 = vmul.f32 %v2346_v50, %v1050_v49  ;;  %v1057_v55 = vmul.f32 %v2347_v51, %v1050_v49  ;;  %v1118_v56 = vsel %vm796_vm5, %v1106_v52, 0.0  ;;  %v1121_v57 = vsel %vm796_vm5, %v1107_v53, 0.0  ;;  %v1020_v51 = vld [vmem:[%s2685_s28] sm:$0x1] }
 0x157   : > { %1119 = vadd.xlane.f32.xlu0 %v1118_v56  ;;  %1122 = vadd.xlane.f32.xlu2 %v1121_v57 }
 0x158   : > { %v1079_v59 = vadd.f32 %v1072_v58, %v1057_v55  ;;  %v1078_v60 = vadd.f32 %v1072_v58, %v1056_v54  ;;  %v1329_v54 = vsub.f32 1.0, %v1020_v51 }
 0x159   : > { %v1004_v61 = vpop.f32.mrf.mxu3 }
 0x15a   : > { %v1010_v62 = vpack.c.bf16 %v1004_v61, %v1004_v61  ;;  %v1087_v63 = vmax.f32 %v1079_v59, 0.0  ;;  %v1086_v0 = vmax.f32 %v1078_v60, 0.0 }
 0x15c   : > { %1015 = vst.msk [vmem:[#allocation4 + $0x1c] sm:$0xf] %vm618_vm0, %v1010_v62  ;;  %v2653_v1 = vmin.f32 %v1087_v63, 1.0  ;;  %v2655_v2 = vmin.f32 %v1086_v0, 1.0  ;;  %v2415_v0 = vld [vmem:[%s2693_s11] ss:$0 sm:$0xff] }
 0x15e   : > { %v1109_v3 = vmul.f32 %v2626_v25, %v2653_v1  ;;  %v1108_v4 = vmul.f32 %v2626_v25, %v2655_v2 }
 0x160   : > { %v1127_v5 = vsel %vm796_vm5, %v1109_v3, 0.0  ;;  %v1124_v6 = vsel %vm796_vm5, %v1108_v4, 0.0  ;;  %v1023_v3 = vld [vmem:[%s2693_s11 + $0x1] sm:$0x1] }
 0x161   : > { %1128 = vadd.xlane.f32.xlu1 %v1127_v5  ;;  %1125 = vadd.xlane.f32.xlu2 %v1124_v6  ;;  %v2315_v5 = vld [vmem:[%s2868_s9 + $0x28] sm:$0xff]  ;;  %v1019_v6 = vld [vmem:[%s2677_s24 + $0x1] sm:$0x1] }
 0x162   : > { %1282 = vmatpush.bf16.msrb.mxu0 %v2315_v5  ;;  %1393 = vmatpush.bf16.msrb.mxu2 %v2315_v5 }
 0x163   : > { %v2374_v7 = vld [vmem:[#allocation4 + $0x18] sm:$0xff]  }
 0x164   : > { %v2351_v8 = vunpack.c.h.bf16 %v2374_v7  ;;  %v2350_v9 = vunpack.c.l.bf16 %v2374_v7 }
 0x166   : > { %v1059_v10 = vmul.f32 %v2351_v8, %v1050_v49  ;;  %v1058_v11 = vmul.f32 %v2350_v9, %v1050_v49  ;;  %v1441_v8 = vsub.f32 1.0, %v1023_v3  ;;  %v2314_v9 = vld [vmem:[%s2868_s9 + $0x20] sm:$0xff] }
 0x167   : > { %1283 = vmatpush.bf16.msrb.mxu0 %v2314_v9  ;;  %1394 = vmatpush.bf16.msrb.mxu2 %v2314_v9 }
 0x168   : > { %v1081_v12 = vadd.f32 %v1072_v58, %v1059_v10  ;;  %v1080_v13 = vadd.f32 %v1072_v58, %v1058_v11  ;;  %v1333_v58 = vperm.slane %v1329_v54, 0  ;;  %v1177_v10 = vsub.f32 1.0, %v1019_v6 }
 0x16a   : > { %v1089_v14 = vmax.f32 %v1081_v12, 0.0  ;;  %v1088_v15 = vmax.f32 %v1080_v13, 0.0  ;;  %v1445_v12 = vperm.slane %v1441_v8, 0 }
 0x16c   : > { %v2663_v16 = vmin.f32 %v1089_v14, 1.0  ;;  %v2665_v17 = vmin.f32 %v1088_v15, 1.0  ;;  %v2313_v14 = vld [vmem:[%s2868_s9 + $0x18] sm:$0xff] }
 0x16d   : > { %1284 = vmatpush.bf16.msrb.mxu0 %v2313_v14  ;;  %1395 = vmatpush.bf16.msrb.mxu2 %v2313_v14 }
 0x16e   : > { %v1111_v18 = vmul.f32 %v2626_v25, %v2663_v16  ;;  %v1110_v19 = vmul.f32 %v2626_v25, %v2665_v17  ;;  %v1021_v25 = vld [vmem:[%s2685_s28 + $0x1] sm:$0x1] }
 0x16f   : > { %v1330_v26 = vsub.f32 1.0, %v1021_v25  ;;  %v2310_v25 = vld [vmem:[%s2868_s9] sm:$0xff] }
 0x170   : > { %v1133_v20 = vsel %vm796_vm5, %v1111_v18, 0.0  ;;  %v1130_v21 = vsel %vm796_vm5, %v1110_v19, 0.0  ;;  %v2312_v19 = vld [vmem:[%s2868_s9 + $0x10] sm:$0xff] }
 0x171   : > { %1134 = vadd.xlane.f32.xlu0 %v1133_v20  ;;  %1131 = vadd.xlane.f32.xlu2 %v1130_v21  ;;  %v1334_v29 = vperm.slane %v1330_v26, 0  ;;  %v2416_v20 = vld [vmem:[%s2685_s28 + $0x1] ss:$0 sm:$0xff]  ;;  %v1022_v21 = vld [vmem:[%s2693_s11] sm:$0x1] }
 0x172   : > { %1285 = vmatpush.bf16.msrb.mxu0 %v2312_v19  ;;  %1396 = vmatpush.bf16.msrb.mxu2 %v2312_v19 }
 0x17a   : > { %1161 = vperm.xlu1 %2406, %v2411_v22   ;;  %v1440_v22 = vsub.f32 1.0, %v1022_v21 }
 0x185   : > { %1165 = vperm.xlu0 %2408, %v2412_v23   ;;  %v1444_v23 = vperm.slane %v1440_v22, 0 }
 0x18d   : > { %1314 = vperm.xlu0 %2408, %v2413_v24   ;;  %v2311_v24 = vld [vmem:[%s2868_s9 + $0x8] sm:$0xff] }
 0x18e   : > { %1286 = vmatpush.bf16.msrb.mxu0 %v2311_v24  ;;  %1397 = vmatpush.bf16.msrb.mxu2 %v2311_v24 }
 0x192   : > { %1287 = vmatpush.bf16.msrb.mxu0 %v2310_v25  ;;  %1398 = vmatpush.bf16.msrb.mxu2 %v2310_v25 }
 0x195   : > { %1340 = vperm.xlu0 %2408, %v1334_v29  }
 0x19d   : > { %1429 = vperm.xlu0 %2408, %v2414_v30  }
 0x1ba   : > { %v1114_v31 = vpop.xlane.xlu2 %1113  ;;  %v1117_v32 = vpop.xlane.xlu1 %1116 }
 0x1bb   : > { %v1136_v33 = vadd.f32 %v1117_v32, %v1114_v31 }
 0x1ca   : > { %v1120_v34 = vpop.xlane.xlu0 %1119  ;;  %v1123_v36 = vpop.xlane.xlu2 %1122 }
 0x1cb   : > { %v1137_v35 = vadd.f32 %v1136_v33, %v1120_v34 }
 0x1cd   : > { %v1138_v37 = vadd.f32 %v1137_v35, %v1123_v36 }
 0x1cf   : > { %v1139_v38 = vrot.slane %v1138_v37, 4 }
 0x1d1   : > { %v1140_v39 = vadd.f32 %v1139_v38, %v1138_v37 }
 0x1d3   : > { %v1141_v40 = vrot.slane %v1140_v39, 2 }
 0x1d4   : > { %v1126_v49 = vpop.xlane.xlu2 %1125  ;;  %v1129_v53 = vpop.xlane.xlu1 %1128 }
 0x1d5   : > { %v1142_v41 = vadd.f32 %v1141_v40, %v1140_v39  ;;  %v1145_v55 = vadd.f32 %v1129_v53, %v1126_v49 }
 0x1d7   : > { %v1143_v43 = vrot.slane %v1142_v41, 1 }
 0x1d9   : > { %v1144_v45 = vadd.f32 %v1143_v43, %v1142_v41 }
 0x1db   : > { %v1154_v48 = vmul.f32 0.0009765625, %v1144_v45 }
 0x1dd   : > { %v1178_v50 = vmul.f32 %v1176_v44, %v1154_v48 }
 0x1df   : > { %v1182_v52 = vperm.slane %v1178_v50, 0 }
 0x1e1   : > { %1185 = vperm.xlu2 %2407, %v1182_v52  }
 0x1e4   : > { %v1132_v56 = vpop.xlane.xlu2 %1131  ;;  %v1135_v59 = vpop.xlane.xlu0 %1134 }
 0x1e5   : > { %v1146_v57 = vadd.f32 %v1145_v55, %v1132_v56 }
 0x1e7   : > { %v1147_v60 = vadd.f32 %v1146_v57, %v1135_v59 }
 0x1e9   : > { %v1148_v61 = vrot.slane %v1147_v60, 4  ;;  %1336 = vperm.xlu2 %2407, %v1333_v58  }
 0x1eb   : > { %v1149_v62 = vadd.f32 %v1148_v61, %v1147_v60 }
 0x1ec   : > { %v1162_v26 = vpop.permute.xlu1 %1161 }
 0x1ed   : > { %v1150_v63 = vrot.slane %v1149_v62, 2  ;;  %v1168_v29 = vmul.f32 %v1162_v26, %v2631_v28  ;;  %v1169_v30 = vmul.f32 %v1162_v26, %v2629_v27  ;;  %v1170_v39 = vmul.f32 %v1162_v26, %v2641_v46 }
 0x1ee   : > { %v1171_v40 = vmul.f32 %v1162_v26, %v2643_v47 }
 0x1ef   : > { %v1151_v4 = vadd.f32 %v1150_v63, %v1149_v62 }
 0x1f1   : > { %v1152_v7 = vrot.slane %v1151_v4, 1  ;;  %1425 = vperm.xlu2 %2407, %v2415_v0  }
 0x1f3   : > { %v1153_v11 = vadd.f32 %v1152_v7, %v1151_v4 }
 0x1f5   : > { %v1155_v13 = vmul.f32 0.0009765625, %v1153_v11 }
 0x1f7   : > { %v1179_v15 = vmul.f32 %v1177_v10, %v1155_v13  ;;  %v1166_v48 = vpop.permute.xlu0 %1165 }
 0x1f8   : > { %v1172_v49 = vmul.f32 %v1166_v48, %v2655_v2  ;;  %v1173_v50 = vmul.f32 %v1166_v48, %v2653_v1  ;;  %v1174_v57 = vmul.f32 %v1166_v48, %v2665_v17  ;;  %v1175_v58 = vmul.f32 %v1166_v48, %v2663_v16 }
 0x1f9   : > { %1451 = vperm.xlu2 %2407, %v1445_v12   ;;  %v1183_v18 = vperm.slane %v1179_v15, 0 }
 0x1fb   : > { %1189 = vperm.xlu1 %2406, %v1183_v18  }
 0x1ff   : > { %v1315_v5 = vpop.permute.xlu0 %1314 }
 0x203   : > { %1318 = vperm.xlu1 %2406, %v2416_v20  }
 0x20b   : > { %1447 = vperm.xlu1 %2406, %v1444_v23  }
 0x23b   : > { %v1186_v31 = vpop.permute.xlu2 %1185 }
 0x23c   : > { %v1192_v32 = vadd.f32 %v1186_v31, %v1168_v29  ;;  %v1193_v33 = vadd.f32 %v1186_v31, %v1169_v30  ;;  %v1194_v41 = vadd.f32 %v1186_v31, %v1170_v39  ;;  %v1195_v42 = vadd.f32 %v1186_v31, %v1171_v40 }
 0x23e   : > { %v1200_v34 = vmax.f32 %v1192_v32, 0.0  ;;  %v1201_v35 = vmax.f32 %v1193_v33, 0.0  ;;  %v1202_v43 = vmax.f32 %v1194_v41, 0.0  ;;  %v1203_v28 = vmax.f32 %v1195_v42, 0.0  ;;  %v1341_v33 = vpop.permute.xlu0 %1340 }
 0x240   : > { %v1208_v36 = vmin.f32 %v1200_v34, 1.0  ;;  %v1209_v37 = vmin.f32 %v1201_v35, 1.0  ;;  %v1210_v44 = vmin.f32 %v1202_v43, 1.0  ;;  %v1211_v27 = vmin.f32 %v1203_v28, 1.0 }
 0x242   : > { %v1228_v38 = vpack.c.bf16 %v1209_v37, %v1208_v36  ;;  %v1229_v45 = vpack.c.bf16 %v1211_v27, %v1210_v44  ;;  %v1321_v6 = vmul.f32 %v1315_v5, %v1208_v36  ;;  %v1322_v8 = vmul.f32 %v1315_v5, %v1209_v37 }
 0x243   : > { %v1337_v3 = vpop.permute.xlu2 %1336  ;;  %v1323_v19 = vmul.f32 %v1315_v5, %v1210_v44  ;;  %v1324_v22 = vmul.f32 %v1315_v5, %v1211_v27 }
 0x244   : > { %2175 = vmatmul.msk.bf16.vlgmr.msrb.gmra.mxu0 %vm796_vm5, %v1228_v38 }
 0x254   : > { %2176 = vmatmul.msk.bf16.gmra.mxu0 %vm796_vm5, %v1229_v45 }
 0x26d   : > { %v1190_v51 = vpop.permute.xlu1 %1189 }
 0x26e   : > { %v1196_v46 = vadd.f32 %v1190_v51, %v1172_v49  ;;  %v1197_v52 = vadd.f32 %v1190_v51, %v1173_v50  ;;  %v1198_v59 = vadd.f32 %v1190_v51, %v1174_v57  ;;  %v1199_v60 = vadd.f32 %v1190_v51, %v1175_v58  ;;  %v1426_v58 = vpop.permute.xlu2 %1425 }
 0x270   : > { %v1204_v47 = vmax.f32 %v1196_v46, 0.0  ;;  %v1205_v53 = vmax.f32 %v1197_v52, 0.0  ;;  %v1206_v61 = vmax.f32 %v1198_v59, 0.0  ;;  %v1207_v2 = vmax.f32 %v1199_v60, 0.0 }
 0x272   : > { %v1212_v54 = vmin.f32 %v1204_v47, 1.0  ;;  %v1213_v55 = vmin.f32 %v1205_v53, 1.0  ;;  %v1214_v62 = vmin.f32 %v1206_v61, 1.0  ;;  %v1215_v1 = vmin.f32 %v1207_v2, 1.0 }
 0x274   : > { %v1230_v56 = vpack.c.bf16 %v1213_v55, %v1212_v54  ;;  %v1231_v63 = vpack.c.bf16 %v1215_v1, %v1214_v62 }
 0x275   : > { %v1319_v34 = vpop.permute.xlu1 %1318 }
 0x276   : > { %2177 = vmatmul.msk.bf16.gmra.mxu0 %vm796_vm5, %v1230_v56  ;;  %v1325_v36 = vmul.f32 %v1319_v34, %v1212_v54  ;;  %v1326_v39 = vmul.f32 %v1319_v34, %v1213_v55  ;;  %v1327_v49 = vmul.f32 %v1319_v34, %v1214_v62  ;;  %v1328_v46 = vmul.f32 %v1319_v34, %v1215_v1  ;;  %v1489_v62 = vld [vmem:[%s2759_s17 + $0xc] sm:$0xf]  ;;  %v1488_v1 = vld [vmem:[%s2759_s17 + $0x8] sm:$0xf] }
 0x277   : > { %1493 = vst.msk [vmem:[#allocation3 + $0xc] sm:$0xf] %vm647_vm1, %v1489_v62  ;;  %1520 = vrot.lane.b32.xlu0 %v1489_v62, %s2442_s13  ;;  %1518 = vrot.lane.b32.xlu1 %v1488_v1, %s2442_s13 }
 0x278   : > { %1492 = vst.msk [vmem:[#allocation3 + $0x8] sm:$0xf] %vm647_vm1, %v1488_v1 }
 0x27d   : > { %v1448_v59 = vpop.permute.xlu1 %1447 }
 0x27f   : > { %1502 = vrot.lane.b32.xlu0 %v1488_v1, %s2443_s18 }
 0x286   : > { %2178 = vmatmul.msk.bf16.gmra.mxu0 %vm796_vm5, %v1231_v63 }
 0x2c1   : > { %v1289_v0 = vpop.f32.mrf.mxu0 }
 0x2c2   : > { %v1343_v4 = vmul.f32 %v1337_v3, %v1289_v0 }
 0x2c4   : > { %v1351_v7 = vadd.f32 %v1343_v4, %v1321_v6  ;;  %v1487_v6 = vld [vmem:[%s2759_s17 + $0x4] sm:$0xf] }
 0x2c5   : > { %1491 = vst.msk [vmem:[#allocation3 + $0x4] sm:$0xf] %vm647_vm1, %v1487_v6  ;;  %1516 = vrot.lane.b32.xlu1 %v1487_v6, %s2442_s13  ;;  %1500 = vrot.lane.b32.xlu0 %v1487_v6, %s2443_s18 }
 0x2c6   : > { %v1359_v9 = vmax.f32 %v1351_v7, 0.0 }
 0x2c8   : > { %v1367_v12 = vmin.f32 %v1359_v9, 1.0 }
 0x2c9   : > { %v1291_v17 = vpop.f32.mrf.mxu0 }
 0x2ca   : > { %v1344_v16 = vmul.f32 %v1337_v3, %v1291_v17  ;;  %v1454_v2 = vmul.f32 %v1448_v59, %v1367_v12 }
 0x2cc   : > { %v1352_v10 = vadd.f32 %v1344_v16, %v1322_v8 }
 0x2ce   : > { %v1360_v11 = vmax.f32 %v1352_v10, 0.0  ;;  %v1486_v10 = vld [vmem:[%s2759_s17] sm:$0xf] }
 0x2cf   : > { %1490 = vst.msk [vmem:[#allocation3] sm:$0xf] %vm647_vm1, %v1486_v10  ;;  %1498 = vrot.lane.b32.xlu1 %v1486_v10, %s2443_s18  ;;  %1514 = vrot.lane.b32.xlu2 %v1486_v10, %s2442_s13 }
 0x2d0   : > { %v2733_v13 = vmin.f32 %v1360_v11, 1.0 }
 0x2d1   : > { %v1294_v14 = vpop.f32.mrf.mxu0 }
 0x2d2   : > { %v1375_v15 = vpack.c.bf16 %v2733_v13, %v1367_v12  ;;  %v1345_v18 = vmul.f32 %v1337_v3, %v1294_v14  ;;  %v1455_v5 = vmul.f32 %v1448_v59, %v2733_v13 }
 0x2d4   : > { %2179 = vmatmul.msk.bf16.vlgmr.msrb.gmra.mxu2 %vm796_vm5, %v1375_v15  ;;  %v1353_v20 = vadd.f32 %v1345_v18, %v1323_v19 }
 0x2d6   : > { %v1361_v24 = vmax.f32 %v1353_v20, 0.0 }
 0x2d7   : > { %1504 = vrot.lane.b32.xlu2 %v1489_v62, %s2443_s18 }
 0x2d8   : > { %v1369_v29 = vmin.f32 %v1361_v24, 1.0  ;;  %v2792_v24 = vld [vmem:[%s2759_s17 + $0x1c] sm:$0xf] }
 0x2d9   : > { %v1296_v21 = vpop.f32.mrf.mxu0  ;;  %1711 = vrot.lane.b32.xlu1 %v2792_v24, %s2442_s13 }
 0x2da   : > { %v1346_v23 = vmul.f32 %v1337_v3, %v1296_v21  ;;  %v1456_v9 = vmul.f32 %v1448_v59, %v1369_v29 }
 0x2dc   : > { %v1354_v25 = vadd.f32 %v1346_v23, %v1324_v22  ;;  %v2316_v22 = vld [vmem:[%s2787_s20] sm:$0xff]  ;;  %v1430_v23 = vpop.permute.xlu0 %1429 }
 0x2de   : > { %v1362_v26 = vmax.f32 %v1354_v25, 0.0  ;;  %v1452_v25 = vpop.permute.xlu2 %1451 }
 0x2e0   : > { %v2737_v30 = vmin.f32 %v1362_v26, 1.0 }
 0x2e2   : > { %v1376_v31 = vpack.c.bf16 %v2737_v30, %v1369_v29  ;;  %v1457_v15 = vmul.f32 %v1448_v59, %v2737_v30  ;;  %v2227_v29 = vld [vmem:[%s2759_s17 + $0x10] sm:$0xf] }
 0x2e3   : > { %1705 = vrot.lane.b32.xlu0 %v2227_v29, %s2442_s13  ;;  %1681 = vst.msk [vmem:[#allocation3] sm:$0xf] %vm647_vm1, %v2227_v29 }
 0x2e4   : > { %2180 = vmatmul.msk.bf16.gmra.mxu2 %vm796_vm5, %v1376_v31 }
 0x2eb   : > { %1695 = vrot.lane.b32.xlu0 %v2792_v24, %s2443_s18 }
 0x2f3   : > { %v1299_v32 = vpop.f32.mrf.mxu0 }
 0x2f4   : > { %v1347_v35 = vmul.f32 %v1341_v33, %v1299_v32 }
 0x2f6   : > { %v1355_v37 = vadd.f32 %v1347_v35, %v1325_v36  ;;  %v2229_v35 = vld [vmem:[%s2759_s17 + $0x18] sm:$0xf] }
 0x2f7   : > { %1693 = vrot.lane.b32.xlu1 %v2229_v35, %s2443_s18  ;;  %1683 = vst.msk [vmem:[#allocation3 + $0x8] sm:$0xf] %vm647_vm1, %v2229_v35  ;;  %1709 = vrot.lane.b32.xlu2 %v2229_v35, %s2442_s13 }
 0x2f8   : > { %v1363_v41 = vmax.f32 %v1355_v37, 0.0 }
 0x2fa   : > { %v2741_v28 = vmin.f32 %v1363_v41, 1.0  ;;  %v2228_v41 = vld [vmem:[%s2759_s17 + $0x14] sm:$0xf] }
 0x2fb   : > { %v1301_v38 = vpop.f32.mrf.mxu0 }
 0x2fc   : > { %v1348_v40 = vmul.f32 %v1341_v33, %v1301_v38  ;;  %v1458_v31 = vmul.f32 %v1452_v25, %v2741_v28  ;;  %v2317_v38 = vld [vmem:[%s2787_s20 + $0x8] sm:$0xff] }
 0x2fe   : > { %v1356_v42 = vadd.f32 %v1348_v40, %v1326_v39 }
 0x2ff   : > { %1691 = vrot.lane.b32.xlu1 %v2228_v41, %s2443_s18  ;;  %1707 = vrot.lane.b32.xlu2 %v2228_v41, %s2442_s13 }
 0x300   : > { %v1364_v43 = vmax.f32 %v1356_v42, 0.0 }
 0x302   : > { %v2743_v44 = vmin.f32 %v1364_v43, 1.0 }
 0x303   : > { %v1304_v27 = vpop.f32.mrf.mxu0 }
 0x304   : > { %v1377_v45 = vpack.c.bf16 %v2743_v44, %v2741_v28  ;;  %v1349_v48 = vmul.f32 %v1341_v33, %v1304_v27  ;;  %v1459_v37 = vmul.f32 %v1452_v25, %v2743_v44 }
 0x306   : > { %2181 = vmatmul.msk.bf16.gmra.mxu2 %vm796_vm5, %v1377_v45  ;;  %v1357_v50 = vadd.f32 %v1349_v48, %v1327_v49 }
 0x307   : > { %1689 = vrot.lane.b32.xlu2 %v2227_v29, %s2443_s18 }
 0x308   : > { %v1365_v47 = vmax.f32 %v1357_v50, 0.0 }
 0x30a   : > { %v2748_v55 = vmin.f32 %v1365_v47, 1.0  ;;  %v2326_v47 = vld [vmem:[%s2787_s20 + $0x10] sm:$0xff] }
 0x30b   : > { %v1306_v51 = vpop.f32.mrf.mxu0 }
 0x30c   : > { %v1350_v52 = vmul.f32 %v1341_v33, %v1306_v51  ;;  %v1460_v28 = vmul.f32 %v1452_v25, %v2748_v55 }
 0x30e   : > { %v1358_v53 = vadd.f32 %v1350_v52, %v1328_v46 }
 0x310   : > { %v1366_v54 = vmax.f32 %v1358_v53, 0.0  ;;  %v2327_v53 = vld [vmem:[%s2787_s20 + $0x18] sm:$0xff] }
 0x312   : > { %v2750_v56 = vmin.f32 %v1366_v54, 1.0 }
 0x314   : > { %v1378_v57 = vpack.c.bf16 %v2750_v56, %v2748_v55  ;;  %v1461_v49 = vmul.f32 %v1452_v25, %v2750_v56  ;;  %v1521_v55 = vpop.permute.xlu0 %1520  ;;  %v1519_v56 = vpop.permute.xlu1 %1518 }
 0x315   : > { %1529 = vst.msk [vmem:[#allocation3 + $0x2c] sm:$0xf] %vm685_vm4, %v1521_v55 }
 0x316   : > { %2182 = vmatmul.msk.bf16.gmra.mxu2 %vm796_vm5, %v1378_v57  ;;  %1528 = vst.msk [vmem:[#allocation3 + $0x28] sm:$0xf] %vm685_vm4, %v1519_v56 }
 0x329   : > { %v1515_v54 = vpop.permute.xlu2 %1514 }
 0x32a   : > { %1526 = vst.msk [vmem:[#allocation3 + $0x20] sm:$0xf] %vm685_vm4, %v1515_v54 }
 0x331   : > { %v1505_v57 = vpop.permute.xlu2 %1504 }
 0x332   : > { %1513 = vst.msk [vmem:[#allocation3 + $0x1c] sm:$0xf] %vm668_vm3, %v1505_v57 }
 0x337   : > { %v1517_v59 = vpop.permute.xlu1 %1516 }
 0x338   : > { %1527 = vst.msk [vmem:[#allocation3 + $0x24] sm:$0xf] %vm685_vm4, %v1517_v59 }
 0x33f   : > { %v2324_v62 = vld [vmem:[#allocation3 + $0x20] sm:$0xff] }
 0x357   : > { %v1400_v60 = vpop.f32.mrf.mxu2 }
 0x358   : > { %v1432_v61 = vmul.f32 %v1426_v58, %v1400_v60  ;;  %v2325_v60 = vld [vmem:[#allocation3 + $0x28] sm:$0xff] }
 0x359   : > { %1643 = vmatpush.bf16.msrb.mxu3 %v2325_v60 }
 0x35a   : > { %v1462_v63 = vadd.f32 %v1454_v2, %v1432_v61  ;;  %v1499_v2 = vpop.permute.xlu1 %1498 }
 0x35b   : > { %1510 = vst.msk [vmem:[#allocation3 + $0x10] sm:$0xf] %vm668_vm3, %v1499_v2 }
 0x35c   : > { %v1470_v0 = vpack.c.bf16 %v1462_v63, %v1462_v63  ;;  %v2321_v63 = vld [vmem:[#allocation3 + $0x8] sm:$0xff] }
 0x35d   : > { %1644 = vmatpush.bf16.msrb.mxu3 %v2324_v62  ;;  %1684 = vst.msk [vmem:[#allocation3 + $0xc] sm:$0xf] %vm647_vm1, %v2792_v24 }
 0x35e   : > { %1478 = vst.msk [vmem:[#allocation4] sm:$0xf] %vm618_vm0, %v1470_v0 }
 0x35f   : > { %v1402_v3 = vpop.f32.mrf.mxu2 }
 0x360   : > { %v1433_v4 = vmul.f32 %v1426_v58, %v1402_v3  ;;  %v2320_v3 = vld [vmem:[#allocation3] sm:$0xff] }
 0x361   : > { %1682 = vst.msk [vmem:[#allocation3 + $0x4] sm:$0xf] %vm647_vm1, %v2228_v41 }
 0x362   : > { %v1463_v7 = vadd.f32 %v1455_v5, %v1433_v4  ;;  %v1710_v4 = vpop.permute.xlu2 %1709  ;;  %v1712_v6 = vpop.permute.xlu1 %1711 }
 0x363   : > { %1719 = vst.msk [vmem:[#allocation3 + $0x28] sm:$0xf] %vm685_vm4, %v1710_v4 }
 0x364   : > { %v1471_v17 = vpack.c.bf16 %v1463_v7, %v1463_v7  ;;  %1720 = vst.msk [vmem:[#allocation3 + $0x2c] sm:$0xf] %vm685_vm4, %v1712_v6 }
 0x366   : > { %1479 = vst.msk [vmem:[#allocation4 + $0x4] sm:$0xf] %vm618_vm0, %v1471_v17 }
 0x367   : > { %v1405_v8 = vpop.f32.mrf.mxu2 }
 0x368   : > { %v1434_v16 = vmul.f32 %v1426_v58, %v1405_v8 }
 0x36a   : > { %v1464_v11 = vadd.f32 %v1456_v9, %v1434_v16  ;;  %v1708_v5 = vpop.permute.xlu2 %1707  ;;  %v1694_v9 = vpop.permute.xlu1 %1693 }
 0x36b   : > { %1718 = vst.msk [vmem:[#allocation3 + $0x24] sm:$0xf] %vm685_vm4, %v1708_v5  ;;  %v2335_v16 = vld [vmem:[#allocation3 + $0x28] sm:$0xff] }
 0x36c   : > { %v1472_v12 = vpack.c.bf16 %v1464_v11, %v1464_v11 }
 0x36d   : > { %v2318_v21 = vld [vmem:[#allocation4] sm:$0xff] }
 0x36e   : > { %1480 = vst.msk [vmem:[#allocation4 + $0x8] sm:$0xf] %vm618_vm0, %v1472_v12 }
 0x36f   : > { %v1407_v13 = vpop.f32.mrf.mxu2 }
 0x370   : > { %v1435_v14 = vmul.f32 %v1426_v58, %v1407_v13  ;;  %v1503_v58 = vpop.permute.xlu0 %1502 }
 0x371   : > { %1512 = vst.msk [vmem:[#allocation3 + $0x18] sm:$0xf] %vm668_vm3, %v1503_v58 }
 0x372   : > { %v1465_v18 = vadd.f32 %v1457_v15, %v1435_v14  ;;  %v1690_v17 = vpop.permute.xlu2 %1689  ;;  %v1692_v14 = vpop.permute.xlu1 %1691 }
 0x374   : > { %v1473_v19 = vpack.c.bf16 %v1465_v18, %v1465_v18 }
 0x376   : > { %1481 = vst.msk [vmem:[#allocation4 + $0xc] sm:$0xf] %vm618_vm0, %v1473_v19 }
 0x378   : > { %v1501_v61 = vpop.permute.xlu0 %1500  ;;  %v2323_v1 = vld [vmem:[#allocation3 + $0x18] sm:$0xff] }
 0x379   : > { %1511 = vst.msk [vmem:[#allocation3 + $0x14] sm:$0xf] %vm668_vm3, %v1501_v61  ;;  %1645 = vmatpush.bf16.msrb.mxu3 %v2323_v1 }
 0x37a   : > { %1703 = vst.msk [vmem:[#allocation3 + $0x18] sm:$0xf] %vm668_vm3, %v1694_v9 }
 0x37d   : > { %v2319_v20 = vld [vmem:[#allocation4 + $0x8] sm:$0xff] }
 0x37e   : > { %1572 = vmatpush.bf16.msrb.mxu1 %v2319_v20  ;;  %v2331_v20 = vld [vmem:[#allocation3 + $0x8] sm:$0xff] }
 0x380   : > { %v2322_v0 = vld [vmem:[#allocation3 + $0x10] sm:$0xff]  ;;  %v1706_v7 = vpop.permute.xlu0 %1705 }
 0x381   : > { %1646 = vmatpush.bf16.msrb.mxu3 %v2322_v0  ;;  %1717 = vst.msk [vmem:[#allocation3 + $0x20] sm:$0xf] %vm685_vm4, %v1706_v7 }
 0x382   : > { %1573 = vmatpush.bf16.msrb.mxu1 %v2318_v21  ;;  %1701 = vst.msk [vmem:[#allocation3 + $0x10] sm:$0xf] %vm668_vm3, %v1690_v17 }
 0x383   : > { %1702 = vst.msk [vmem:[#allocation3 + $0x14] sm:$0xf] %vm668_vm3, %v1692_v14 }
 0x385   : > { %2199 = vmatmul.msk.bf16.vlgmr.msrb.gmra.mxu1 %vm720_vm2, %v2316_v22  ;;  %1647 = vmatpush.bf16.msrb.mxu3 %v2321_v63 }
 0x388   : > { %v1696_v10 = vpop.permute.xlu0 %1695  ;;  %v2334_v11 = vld [vmem:[#allocation3 + $0x20] sm:$0xff] }
 0x389   : > { %v1410_v26 = vpop.f32.mrf.mxu2  ;;  %1648 = vmatpush.bf16.msrb.mxu3 %v2320_v3  ;;  %1704 = vst.msk [vmem:[#allocation3 + $0x1c] sm:$0xf] %vm668_vm3, %v1696_v10 }
 0x38a   : > { %v1436_v30 = vmul.f32 %v1430_v23, %v1410_v26  ;;  %v2332_v19 = vld [vmem:[#allocation3 + $0x10] sm:$0xff] }
 0x38c   : > { %v1466_v32 = vadd.f32 %v1458_v31, %v1436_v30 }
 0x38d   : > { %1835 = vmatpush.bf16.msra.mxu3 %v2335_v16 }
 0x38e   : > { %v1474_v33 = vpack.c.bf16 %v1466_v32, %v1466_v32 }
 0x390   : > { %1482 = vst.msk [vmem:[#allocation4 + $0x10] sm:$0xf] %vm618_vm0, %v1474_v33  ;;  %v2333_v15 = vld [vmem:[#allocation3 + $0x18] sm:$0xff] }
 0x391   : > { %v1412_v34 = vpop.f32.mrf.mxu2  ;;  %1836 = vmatpush.bf16.msra.mxu3 %v2334_v11 }
 0x392   : > { %v1437_v36 = vmul.f32 %v1430_v23, %v1412_v34 }
 0x394   : > { %v1467_v39 = vadd.f32 %v1459_v37, %v1437_v36 }
 0x395   : > { %2200 = vmatmul.msk.bf16.gmra.mxu1 %vm720_vm2, %v2317_v38  ;;  %1837 = vmatpush.bf16.msra.mxu3 %v2333_v15 }
 0x396   : > { %v1475_v40 = vpack.c.bf16 %v1467_v39, %v1467_v39 }
 0x398   : > { %1483 = vst.msk [vmem:[#allocation4 + $0x14] sm:$0xf] %vm618_vm0, %v1475_v40 }
 0x399   : > { %v1415_v42 = vpop.f32.mrf.mxu2  ;;  %1838 = vmatpush.bf16.msra.mxu3 %v2332_v19 }
 0x39a   : > { %v1438_v43 = vmul.f32 %v1430_v23, %v1415_v42 }
 0x39c   : > { %v1468_v44 = vadd.f32 %v1460_v28, %v1438_v43 }
 0x39d   : > { %1839 = vmatpush.bf16.msra.mxu3 %v2331_v20 }
 0x39e   : > { %v1476_v27 = vpack.c.bf16 %v1468_v44, %v1468_v44 }
 0x39f   : > { %v2328_v52 = vld [vmem:[#allocation4 + $0x10] sm:$0xff] }
 0x3a0   : > { %1484 = vst.msk [vmem:[#allocation4 + $0x18] sm:$0xf] %vm618_vm0, %v1476_v27 }
 0x3a1   : > { %v1417_v45 = vpop.f32.mrf.mxu2 }
 0x3a2   : > { %v1439_v48 = vmul.f32 %v1430_v23, %v1417_v45  ;;  %v2330_v23 = vld [vmem:[#allocation3] sm:$0xff] }
 0x3a3   : > { %1840 = vmatpush.bf16.msra.mxu3 %v2330_v23 }
 0x3a4   : > { %v1469_v50 = vadd.f32 %v1461_v49, %v1439_v48 }
 0x3a6   : > { %v1477_v51 = vpack.c.bf16 %v1469_v50, %v1469_v50 }
 0x3a8   : > { %1485 = vst.msk [vmem:[#allocation4 + $0x1c] sm:$0xf] %vm618_vm0, %v1477_v51 }
 0x3af   : > { %v2329_v46 = vld [vmem:[#allocation4 + $0x18] sm:$0xff] }
 0x3b0   : > { %1764 = vmatpush.bf16.msra.mxu1 %v2329_v46 }
 0x3b4   : > { %1765 = vmatpush.bf16.msra.mxu1 %v2328_v52 }
 0x3b7   : > { %2251 = vmatmul.msk.bf16.vlgmr.msra.gmra.mxu1 %vm720_vm2, %v2326_v47 }
 0x3c7   : > { %2252 = vmatmul.msk.bf16.gmra.mxu1 %vm720_vm2, %v2327_v53 }
 0x402   : > { %v1575_v8 = vpop.f32.mrf.mxu1 }
 0x40a   : > { %v1577_v12 = vpop.f32.mrf.mxu1 }
 0x40b   : > { %v1585_v13 = vpack.c.bf16 %v1577_v12, %v1575_v8 }
 0x40d   : > { %2225 = vmatmul.msk.bf16.vlgmr.msrb.gmra.mxu3 %vm796_vm5, %v1585_v13 }
 0x412   : > { %v1580_v18 = vpop.f32.mrf.mxu1 }
 0x41a   : > { %v1582_v21 = vpop.f32.mrf.mxu1 }
 0x41b   : > { %v1586_v22 = vpack.c.bf16 %v1582_v21, %v1580_v18 }
 0x41d   : > { %2226 = vmatmul.msk.bf16.gmra.mxu3 %vm796_vm5, %v1586_v22 }
 0x434   : > { %v1767_v24 = vpop.f32.mrf.mxu1 }
 0x43c   : > { %v1769_v25 = vpop.f32.mrf.mxu1 }
 0x43d   : > { %v1777_v26 = vpack.c.bf16 %v1769_v25, %v1767_v24 }
 0x43f   : > { %2277 = vmatmul.msk.bf16.vlgmr.msra.gmra.mxu3 %vm796_vm5, %v1777_v26 }
 0x444   : > { %v1772_v29 = vpop.f32.mrf.mxu1 }
 0x44c   : > { %v1774_v30 = vpop.f32.mrf.mxu1 }
 0x44d   : > { %v1778_v31 = vpack.c.bf16 %v1774_v30, %v1772_v29 }
 0x44f   : > { %2278 = vmatmul.msk.bf16.gmra.mxu3 %vm796_vm5, %v1778_v31 }
 0x490   : > { %v1650_v32 = vpop.f32.mrf.mxu3 }
 0x491   : > { %v1660_v33 = vmax.f32 %v1650_v32, 0.0 }
 0x493   : > { %v1664_v35 = vmin.f32 %v1660_v33, 1.0 }
 0x498   : > { %v1652_v34 = vpop.f32.mrf.mxu3 }
 0x499   : > { %v1661_v36 = vmax.f32 %v1652_v34, 0.0 }
 0x49b   : > { %v1665_v37 = vmin.f32 %v1661_v36, 1.0 }
 0x49d   : > { %v2355_v38 = vpack.c.bf16 %v1665_v37, %v1664_v35 }
 0x49f   : > { %2356 = vst [vmem:[%s614_s21] sm:$0xff] %v2355_v38  }
 0x4a0   : > { %v1655_v39 = vpop.f32.mrf.mxu3 }
 0x4a1   : > { %v1662_v40 = vmax.f32 %v1655_v39, 0.0 }
 0x4a3   : > { %v1666_v42 = vmin.f32 %v1662_v40, 1.0 }
 0x4a8   : > { %v1657_v41 = vpop.f32.mrf.mxu3 }
 0x4a9   : > { %v1663_v43 = vmax.f32 %v1657_v41, 0.0 }
 0x4ab   : > { %v1667_v28 = vmin.f32 %v1663_v43, 1.0 }
 0x4ad   : > { %v2360_v44 = vpack.c.bf16 %v1667_v28, %v1666_v42 }
 0x4af   : > { %2375 = vst [vmem:[%s614_s21 + $0x8] sm:$0xff] %v2360_v44  }
 0x4c2   : > { %v1842_v27 = vpop.f32.mrf.mxu3 }
 0x4c3   : > { %v1852_v45 = vmax.f32 %v1842_v27, 0.0 }
 0x4c5   : > { %v1856_v50 = vmin.f32 %v1852_v45, 1.0 }
 0x4ca   : > { %v1844_v48 = vpop.f32.mrf.mxu3 }
 0x4cb   : > { %v1853_v49 = vmax.f32 %v1844_v48, 0.0 }
 0x4cd   : > { %v1857_v51 = vmin.f32 %v1853_v49, 1.0 }
 0x4cf   : > { %v2365_v46 = vpack.c.bf16 %v1857_v51, %v1856_v50 }
 0x4d1   : > { %2376 = vst [vmem:[%s614_s21 + $0x10] sm:$0xff] %v2365_v46  }
 0x4d2   : > { %v1847_v52 = vpop.f32.mrf.mxu3 }
 0x4d3   : > { %v1854_v47 = vmax.f32 %v1847_v52, 0.0 }
 0x4d5   : > { %v1858_v55 = vmin.f32 %v1854_v47, 1.0 }
 0x4da   : > { %v1849_v53 = vpop.f32.mrf.mxu3 }
 0x4db   : > { %v1855_v54 = vmax.f32 %v1849_v53, 0.0 }
 0x4dd   : > { %v1859_v56 = vmin.f32 %v1855_v54, 1.0 }
 0x4df   : > { %v2370_v57 = vpack.c.bf16 %v1859_v56, %v1858_v55 }
 0x4e1   : > { %2377 = vst [vmem:[%s614_s21 + $0x18] sm:$0xff] %v2370_v57  }
 0x4e2 PF: > { %s20_s15 = sadd.s32 1, %s2439_s15   ;;  %s2870_s13 = smov %s2435_s14 }
 0x4e3   : > { %p17_p5 = scmp.ge.s32.totalorder %s20_s15, 4   ;;  %s2871_s14 = smov %s2873_s16 }
 0x4e5   :  { %19 = sbr.rel (!%p17_p5) target bundleno = 2 (0x2), region = 121 }

</bundles_post_ra>
